<compile_context>
chip_gen: v7x
topology: tpu7x:2x2x1
jax: 0.10.0
libtpu: 0.0.40
codegen_flags: <defaults>
</compile_context>

<pallas_src>
import math

import jax
import jax.numpy as jnp
from jax.experimental import pallas as pl
from jax.experimental.pallas import tpu as pltpu


def cross_attn_kernel(gamma_ref, wm_ref, tile_ref, exp_ref, expT_ref,
                      wx0_ref, whi_ref, rn_ref, rbs_ref, rs_ref,
                      hi_ref, x0_ref, out_ref, attn_ref):
    # Per-grid-step block shapes (Bt batch elements per step, lane index j = r*dim + d):
    #   gamma_ref : SMEM (1,)
    #   wm_ref    : (dim, dim)              = Wq^T @ Wk
    #   tile_ref  : (dim, rf*dim)           T[d', r*dim+d] = delta(d', d)      (lane tiling)
    #   exp_ref   : (rf,  rf*dim)           E[r', r*dim+d] = delta(r', r)      (lane expansion)
    #   expT_ref  : (rf*dim, rf)            = E^T
    #   wx0_ref   : (Bt*nf, Bt*S*nf)        confuse_x0 selection (w_x0 on block diag)
    #   whi_ref   : (Bt,    Bt*S)           confuse_hi selection (w_hi on block diag)
    #   rn_ref    : (Bt*nf, Bt)             row-repeat  b        -> (b, n)
    #   rbs_ref   : (Bt*S*nf, Bt*S)         row-repeat  (b, s)   -> (b, s, n)
    #   rs_ref    : (Bt*S*nf, Bt*nf)        row-repeat  (b, n)   -> (b, s, n)
    #   hi_ref    : (1, Bt*S,    rf*dim)    lane-packed hi
    #   x0_ref    : (1, Bt*S*nf, dim)       flattened x0
    #   out_ref   : (1, Bt*S*nf, rf*dim)    lane-dense output slab
    #   attn_ref  : (1, Bt*nf,   rf)
    f32 = jnp.float32
    x0 = x0_ref[0].astype(f32)                                         # (Bt*S*nf, dim)
    hi = hi_ref[0].astype(f32)                                         # (Bt*S,  rf*dim)

    # confuse_x0 / confuse_hi: 1x1 convs over seq_len as single MXU matmuls.
    xf = jnp.dot(wx0_ref[...], x0, preferred_element_type=f32)         # (Bt*nf, dim)
    hf = jnp.dot(whi_ref[...], hi, preferred_element_type=f32)         # (Bt,    rf*dim)

    # energy[(b,n), r] = xf[(b,n),:] @ (Wq^T Wk) @ hf[b,r,:]
    t = jnp.dot(xf, wm_ref[...], preferred_element_type=f32)           # (Bt*nf, dim)
    t_tiled = jnp.dot(t, tile_ref[...], preferred_element_type=f32)    # (Bt*nf, rf*dim)
    hf_bc = jnp.dot(rn_ref[...], hf, preferred_element_type=f32)       # (Bt*nf, rf*dim)
    energy = jnp.dot(t_tiled * hf_bc, expT_ref[...],
                     preferred_element_type=f32)                       # (Bt*nf, rf)

    # Stable softmax over rf; exact normalization (attn is an exported probability).
    m = jnp.max(energy, axis=-1, keepdims=True)
    p = jnp.exp(energy - m)
    attn = p / jnp.sum(p, axis=-1, keepdims=True)                      # (Bt*nf, rf)
    attn_ref[0] = attn.astype(attn_ref.dtype)

    # out[(b,s,n), r*dim+d] = x0[b,s,n,d] * hi[b,s,r,d] * (gamma*attn[b,n,r] + 1)
    scale = gamma_ref[0] * attn + 1.0                                  # (Bt*nf, rf)
    scale_bc = jnp.dot(jnp.dot(rs_ref[...], scale, preferred_element_type=f32),
                       exp_ref[...], preferred_element_type=f32)       # (Bt*S*nf, rf*dim)
    hi_bc = jnp.dot(rbs_ref[...], hi, preferred_element_type=f32)      # (Bt*S*nf, rf*dim)
    x0t = jnp.dot(x0, tile_ref[...], preferred_element_type=f32)       # (Bt*S*nf, rf*dim)
    out_ref[0] = (x0t * hi_bc * scale_bc).astype(out_ref.dtype)        # one unmasked slab store


def _pick_block_b(B, target=16):
    """Largest divisor of B that is <= target while keeping >= 2 grid steps
    (so both v7x TensorCores get work).  On single-TC v5e/v6e the one extra
    step costs ~0.35 us, negligible once each step moves 100s of KB."""
    best = 1
    for cand in range(1, B + 1):
        if cand > target:
            break
        if B % cand:
            continue
        if B >= 2 and B // cand < 2:
            continue
        best = cand
    return best


def cross_attn(hi, x0, params, block_b=None, out_dtype=None):
    """hi: (B, S, rf, dim), x0: (B, S, nf, dim) -> (out (B,S,nf*rf,dim), attn (B,nf,rf))."""
    B, S, rf, dim = hi.shape
    nf = x0.shape[2]
    f32 = jnp.float32
    out_dtype = hi.dtype if out_dtype is None else out_dtype

    bt = _pick_block_b(B) if block_b is None else block_b
    assert B % bt == 0, "block_b must divide B"
    G = B // bt

    # Fold the query/key 1x1 convs into a single (dim, dim) matrix.
    wq = params["wq"].astype(f32)                                  # (dqk, dim)
    wk = params["wk"].astype(f32)                                  # (dqk, dim)
    wm = wq.T @ wk                                                 # (dim, dim)

    # Constant MXU matrices: lane tiling/expansion + row broadcast/selection.
    eye_d = jnp.eye(dim, dtype=f32)
    eye_r = jnp.eye(rf, dtype=f32)
    eye_n = jnp.eye(nf, dtype=f32)
    eye_b = jnp.eye(bt, dtype=f32)
    tile_m = jnp.tile(eye_d, (1, rf))                              # (dim, rf*dim)
    exp_m = jnp.repeat(eye_r, dim, axis=1)                         # (rf,  rf*dim)
    exp_mT = jnp.repeat(eye_r, dim, axis=0)                        # (rf*dim, rf)
    w_x0 = params["w_x0"].astype(f32).reshape(1, S)
    w_hi = params["w_hi"].astype(f32).reshape(1, S)
    wx0_sel = jnp.kron(eye_b, jnp.kron(w_x0, eye_n))               # (Bt*nf, Bt*S*nf)
    whi_sel = jnp.kron(eye_b, w_hi)                                # (Bt,    Bt*S)
    rn = jnp.repeat(eye_b, nf, axis=0)                             # (Bt*nf, Bt)
    rbs = jnp.repeat(jnp.eye(bt * S, dtype=f32), nf, axis=0)       # (Bt*S*nf, Bt*S)
    rs = jnp.kron(eye_b, jnp.kron(jnp.ones((S, 1), f32), eye_n))   # (Bt*S*nf, Bt*nf)

    # Contiguous (free) reshapes: fold Bt batch groups into the grid axis so
    # every in-kernel tensor is a flat 2-D slab (no in-kernel relayout).
    hi_g = hi.reshape(G, bt * S, rf * dim)
    x0_g = x0.reshape(G, bt * S * nf, dim)

    c0 = lambda b: (0, 0)
    out_g, attn_g = pl.pallas_call(
        cross_attn_kernel,
        out_shape=(
            jax.ShapeDtypeStruct((G, bt * S * nf, rf * dim), out_dtype),
            jax.ShapeDtypeStruct((G, bt * nf, rf), jnp.float32),
        ),
        grid=(G,),
        in_specs=[
            pl.BlockSpec(memory_space=pltpu.MemorySpace.SMEM),             # gamma (1,)
            pl.BlockSpec((dim, dim), c0),                                  # Wq^T @ Wk
            pl.BlockSpec((dim, rf * dim), c0),                             # tile_m
            pl.BlockSpec((rf, rf * dim), c0),                              # exp_m
            pl.BlockSpec((rf * dim, rf), c0),                              # exp_m^T
            pl.BlockSpec((bt * nf, bt * S * nf), c0),                      # confuse_x0 sel
            pl.BlockSpec((bt, bt * S), c0),                                # confuse_hi sel
            pl.BlockSpec((bt * nf, bt), c0),                               # b -> (b,n)
            pl.BlockSpec((bt * S * nf, bt * S), c0),                       # (b,s) -> (b,s,n)
            pl.BlockSpec((bt * S * nf, bt * nf), c0),                      # (b,n) -> (b,s,n)
            pl.BlockSpec((1, bt * S, rf * dim), lambda b: (b, 0, 0)),      # hi (lane-packed)
            pl.BlockSpec((1, bt * S * nf, dim), lambda b: (b, 0, 0)),      # x0 (flattened)
        ],
        out_specs=(
            pl.BlockSpec((1, bt * S * nf, rf * dim), lambda b: (b, 0, 0)),
            pl.BlockSpec((1, bt * nf, rf), lambda b: (b, 0, 0)),
        ),
        compiler_params=pltpu.CompilerParams(
            dimension_semantics=("parallel",),     # shards batch groups across v7x TCs
        ),
    )(params["gamma"].astype(f32), wm, tile_m, exp_m, exp_mT,
      wx0_sel, whi_sel, rn, rbs, rs, hi_g, x0_g)

    out = out_g.reshape(B, S, nf, rf, dim).reshape(B, S, nf * rf, dim)  # contiguous -> free
    attn = attn_g.reshape(B, nf, rf)
    return out, attn


def cross_attn_ref(hi, x0, params):
    """Pure-JAX reference of the PyTorch forward (eval mode)."""
    B, S, rf, dim = hi.shape
    nf = x0.shape[2]
    hf = jnp.einsum('s,bsrd->brd', params["w_hi"], hi)          # confuse_hi
    xf = jnp.einsum('s,bsnd->bnd', params["w_x0"], x0)          # confuse_x0
    query = jnp.einsum('bnd,qd->bnq', xf, params["wq"])         # query_conv
    key = jnp.einsum('brd,qd->brq', hf, params["wk"])           # key_conv
    energy = jnp.einsum('bnq,brq->bnr', query, key)             # bmm
    attn = jax.nn.softmax(energy, axis=-1)
    value = x0[:, :, :, None, :] * hi[:, :, None, :, :]         # (B,S,nf,rf,dim)
    out = params["gamma"][0] * value * attn[:, None, :, :, None] + value
    return out.reshape(B, S, nf * rf, dim), attn


if __name__ == "__main__":
    B, S, rf, nf = 8, 5, 8, 8                    # -> Bt=4, grid=(2,): both v7x cores busy
    in_dim, ch_factor = 32, 2
    dqk = in_dim // ch_factor

    key = jax.random.PRNGKey(0)
    k1, k2, k3, k4, k5, k6 = jax.random.split(key, 6)

    params = {
        "w_hi": jax.random.normal(k1, (S,), jnp.float32) / math.sqrt(S),
        "w_x0": jax.random.normal(k2, (S,), jnp.float32) / math.sqrt(S),
        "wq": jax.random.normal(k3, (dqk, in_dim), jnp.float32) / math.sqrt(in_dim),
        "wk": jax.random.normal(k4, (dqk, in_dim), jnp.float32) / math.sqrt(in_dim),
        # module inits gamma to zeros; use a nonzero value so the attention
        # scaling path is actually exercised by the check below.
        "gamma": jnp.full((1,), 0.5, jnp.float32),
    }

    hi = jax.random.normal(k5, (B, S, rf, in_dim), jnp.float32)
    x0 = jax.random.normal(k6, (B, S, nf, in_dim), jnp.float32)

    out, attn = cross_attn(hi, x0, params)
    jax.block_until_ready((out, attn))

    out_ref, attn_ref = cross_attn_ref(hi, x0, params)
    assert out.shape == (B, S, nf * rf, in_dim)
    assert attn.shape == (B, nf, rf)
    # tolerances cover MXU default-precision / association differences vs the
    # XLA reference (softmax normalization itself is exact now)
    assert jnp.allclose(attn, attn_ref, atol=5e-3, rtol=5e-3)
    assert jnp.allclose(out, out_ref, atol=5e-3, rtol=5e-3)

    print("KERNEL_OK")
</pallas_src>

<mosaic_0001>
module attributes {stable_mosaic.version = 11 : i64} {
  func.func @cross_attn_kernel(%arg0: i32, %arg1: memref<1xf32, #tpu.memory_space<smem>>, %arg2: memref<32x32xf32, #tpu.memory_space<vmem>>, %arg3: memref<32x256xf32, #tpu.memory_space<vmem>>, %arg4: memref<8x256xf32, #tpu.memory_space<vmem>>, %arg5: memref<256x8xf32, #tpu.memory_space<vmem>>, %arg6: memref<32x160xf32, #tpu.memory_space<vmem>>, %arg7: memref<4x20xf32, #tpu.memory_space<vmem>>, %arg8: memref<32x4xf32, #tpu.memory_space<vmem>>, %arg9: memref<160x20xf32, #tpu.memory_space<vmem>>, %arg10: memref<160x32xf32, #tpu.memory_space<vmem>>, %arg11: memref<1x20x256xf32, #tpu.memory_space<vmem>>, %arg12: memref<1x160x32xf32, #tpu.memory_space<vmem>>, %arg13: memref<1x160x256xf32, #tpu.memory_space<vmem>>, %arg14: memref<1x32x8xf32, #tpu.memory_space<vmem>>) attributes {dimension_semantics = [#tpu.dimension_semantics<parallel>], iteration_bounds = array<i64: 2>, scalar_prefetch = 0 : i64, scratch_operands = 0 : i64, tpu.core_type = #tpu.core_type<tc>, window_params = [{transform_indices = @transform_0, window_bounds = array<i64: 1>}, {pipeline_mode = #tpu.pipeline_mode<synchronous>, transform_indices = @transform_1, window_bounds = array<i64: 32, 32>}, {pipeline_mode = #tpu.pipeline_mode<synchronous>, transform_indices = @transform_2, window_bounds = array<i64: 32, 256>}, {pipeline_mode = #tpu.pipeline_mode<synchronous>, transform_indices = @transform_3, window_bounds = array<i64: 8, 256>}, {pipeline_mode = #tpu.pipeline_mode<synchronous>, transform_indices = @transform_4, window_bounds = array<i64: 256, 8>}, {pipeline_mode = #tpu.pipeline_mode<synchronous>, transform_indices = @transform_5, window_bounds = array<i64: 32, 160>}, {pipeline_mode = #tpu.pipeline_mode<synchronous>, transform_indices = @transform_6, window_bounds = array<i64: 4, 20>}, {pipeline_mode = #tpu.pipeline_mode<synchronous>, transform_indices = @transform_7, window_bounds = array<i64: 32, 4>}, {pipeline_mode = #tpu.pipeline_mode<synchronous>, transform_indices = @transform_8, window_bounds = array<i64: 160, 20>}, {pipeline_mode = #tpu.pipeline_mode<synchronous>, transform_indices = @transform_9, window_bounds = array<i64: 160, 32>}, {transform_indices = @transform_10, window_bounds = array<i64: 1, 20, 256>}, {transform_indices = @transform_11, window_bounds = array<i64: 1, 160, 32>}, {transform_indices = @transform_12, window_bounds = array<i64: 1, 160, 256>}, {transform_indices = @transform_13, window_bounds = array<i64: 1, 32, 8>}]} {
    %c0 = arith.constant 0 : index
    %c0_0 = arith.constant 0 : index
    %c0_1 = arith.constant 0 : index
    %0 = vector.load %arg12[%c0, %c0_0, %c0_1] : memref<1x160x32xf32, #tpu.memory_space<vmem>>, vector<1x160x32xf32>
    %1 = vector.shape_cast %0 : vector<1x160x32xf32> to vector<160x32xf32>
    %c0_2 = arith.constant 0 : index
    %c0_3 = arith.constant 0 : index
    %c0_4 = arith.constant 0 : index
    %2 = vector.load %arg11[%c0_2, %c0_3, %c0_4] : memref<1x20x256xf32, #tpu.memory_space<vmem>>, vector<1x20x256xf32>
    %3 = vector.shape_cast %2 : vector<1x20x256xf32> to vector<20x256xf32>
    %c0_5 = arith.constant 0 : index
    %c0_6 = arith.constant 0 : index
    %4 = vector.load %arg6[%c0_5, %c0_6] : memref<32x160xf32, #tpu.memory_space<vmem>>, vector<32x160xf32>
    %cst = arith.constant dense<0.000000e+00> : vector<32x32xf32>
    %5 = tpu.matmul %4, %1, %cst {dimension_numbers = #tpu.dot_dimension_numbers<[1], [0], [0], [1], [0, 0, 1, 1], [], []>} : vector<32x160xf32>, vector<160x32xf32>, vector<32x32xf32> -> vector<32x32xf32>
    %c0_7 = arith.constant 0 : index
    %c0_8 = arith.constant 0 : index
    %6 = vector.load %arg7[%c0_7, %c0_8] : memref<4x20xf32, #tpu.memory_space<vmem>>, vector<4x20xf32>
    %cst_9 = arith.constant dense<0.000000e+00> : vector<4x256xf32>
    %7 = tpu.matmul %6, %3, %cst_9 {dimension_numbers = #tpu.dot_dimension_numbers<[1], [0], [0], [1], [0, 0, 1, 1], [], []>} : vector<4x20xf32>, vector<20x256xf32>, vector<4x256xf32> -> vector<4x256xf32>
    %c0_10 = arith.constant 0 : index
    %c0_11 = arith.constant 0 : index
    %8 = vector.load %arg2[%c0_10, %c0_11] : memref<32x32xf32, #tpu.memory_space<vmem>>, vector<32x32xf32>
    %cst_12 = arith.constant dense<0.000000e+00> : vector<32x32xf32>
    %9 = tpu.matmul %5, %8, %cst_12 {dimension_numbers = #tpu.dot_dimension_numbers<[1], [0], [0], [1], [0, 0, 1, 1], [], []>} : vector<32x32xf32>, vector<32x32xf32>, vector<32x32xf32> -> vector<32x32xf32>
    %c0_13 = arith.constant 0 : index
    %c0_14 = arith.constant 0 : index
    %10 = vector.load %arg3[%c0_13, %c0_14] : memref<32x256xf32, #tpu.memory_space<vmem>>, vector<32x256xf32>
    %cst_15 = arith.constant dense<0.000000e+00> : vector<32x256xf32>
    %11 = tpu.matmul %9, %10, %cst_15 {dimension_numbers = #tpu.dot_dimension_numbers<[1], [0], [0], [1], [0, 0, 1, 1], [], []>} : vector<32x32xf32>, vector<32x256xf32>, vector<32x256xf32> -> vector<32x256xf32>
    %c0_16 = arith.constant 0 : index
    %c0_17 = arith.constant 0 : index
    %12 = vector.load %arg8[%c0_16, %c0_17] : memref<32x4xf32, #tpu.memory_space<vmem>>, vector<32x4xf32>
    %cst_18 = arith.constant dense<0.000000e+00> : vector<32x256xf32>
    %13 = tpu.matmul %12, %7, %cst_18 {dimension_numbers = #tpu.dot_dimension_numbers<[1], [0], [0], [1], [0, 0, 1, 1], [], []>} : vector<32x4xf32>, vector<4x256xf32>, vector<32x256xf32> -> vector<32x256xf32>
    %14 = arith.mulf %11, %13 : vector<32x256xf32>
    %c0_19 = arith.constant 0 : index
    %c0_20 = arith.constant 0 : index
    %15 = vector.load %arg5[%c0_19, %c0_20] : memref<256x8xf32, #tpu.memory_space<vmem>>, vector<256x8xf32>
    %cst_21 = arith.constant dense<0.000000e+00> : vector<32x8xf32>
    %16 = tpu.matmul %14, %15, %cst_21 {dimension_numbers = #tpu.dot_dimension_numbers<[1], [0], [0], [1], [0, 0, 1, 1], [], []>} : vector<32x256xf32>, vector<256x8xf32>, vector<32x8xf32> -> vector<32x8xf32>
    %cst_22 = arith.constant dense<0xFF800000> : vector<32xf32>
    %17 = vector.multi_reduction <maximumf>, %16, %cst_22 [1] : vector<32x8xf32> to vector<32xf32>
    %18 = vector.shape_cast %17 : vector<32xf32> to vector<32x1xf32>
    %19 = vector.broadcast %18 : vector<32x1xf32> to vector<32x8xf32>
    %20 = arith.subf %16, %19 : vector<32x8xf32>
    %21 = math.exp %20 : vector<32x8xf32>
    %cst_23 = arith.constant dense<0.000000e+00> : vector<32xf32>
    %22 = vector.multi_reduction <add>, %21, %cst_23 [1] : vector<32x8xf32> to vector<32xf32>
    %23 = vector.shape_cast %22 : vector<32xf32> to vector<32x1xf32>
    %24 = vector.broadcast %23 : vector<32x1xf32> to vector<32x8xf32>
    %25 = arith.divf %21, %24 : vector<32x8xf32>
    %c0_24 = arith.constant 0 : index
    %c0_25 = arith.constant 0 : index
    %c0_26 = arith.constant 0 : index
    %26 = vector.load %arg14[%c0_24, %c0_25, %c0_26] : memref<1x32x8xf32, #tpu.memory_space<vmem>>, vector<1x32x8xf32>
    %27 = vector.shape_cast %26 : vector<1x32x8xf32> to vector<32x8xf32>
    %28 = vector.shape_cast %25 : vector<32x8xf32> to vector<1x32x8xf32>
    tpu.vector_store %arg14[%c0_24, %c0_25, %c0_26], %28 {strides = array<i32>} : memref<1x32x8xf32, #tpu.memory_space<vmem>>, vector<1x32x8xf32>,
    %c0_27 = arith.constant 0 : index
    %29 = memref.load %arg1[%c0_27] : memref<1xf32, #tpu.memory_space<smem>>
    %30 = vector.broadcast %29 : f32 to vector<32x8xf32>
    %31 = arith.mulf %30, %25 : vector<32x8xf32>
    %cst_28 = arith.constant 1.000000e+00 : f32
    %32 = vector.broadcast %cst_28 : f32 to vector<32x8xf32>
    %33 = arith.addf %31, %32 : vector<32x8xf32>
    %c0_29 = arith.constant 0 : index
    %c0_30 = arith.constant 0 : index
    %34 = vector.load %arg10[%c0_29, %c0_30] : memref<160x32xf32, #tpu.memory_space<vmem>>, vector<160x32xf32>
    %cst_31 = arith.constant dense<0.000000e+00> : vector<160x8xf32>
    %35 = tpu.matmul %34, %33, %cst_31 {dimension_numbers = #tpu.dot_dimension_numbers<[1], [0], [0], [1], [0, 0, 1, 1], [], []>} : vector<160x32xf32>, vector<32x8xf32>, vector<160x8xf32> -> vector<160x8xf32>
    %c0_32 = arith.constant 0 : index
    %c0_33 = arith.constant 0 : index
    %36 = vector.load %arg4[%c0_32, %c0_33] : memref<8x256xf32, #tpu.memory_space<vmem>>, vector<8x256xf32>
    %cst_34 = arith.constant dense<0.000000e+00> : vector<160x256xf32>
    %37 = tpu.matmul %35, %36, %cst_34 {dimension_numbers = #tpu.dot_dimension_numbers<[1], [0], [0], [1], [0, 0, 1, 1], [], []>} : vector<160x8xf32>, vector<8x256xf32>, vector<160x256xf32> -> vector<160x256xf32>
    %c0_35 = arith.constant 0 : index
    %c0_36 = arith.constant 0 : index
    %38 = vector.load %arg9[%c0_35, %c0_36] : memref<160x20xf32, #tpu.memory_space<vmem>>, vector<160x20xf32>
    %cst_37 = arith.constant dense<0.000000e+00> : vector<160x256xf32>
    %39 = tpu.matmul %38, %3, %cst_37 {dimension_numbers = #tpu.dot_dimension_numbers<[1], [0], [0], [1], [0, 0, 1, 1], [], []>} : vector<160x20xf32>, vector<20x256xf32>, vector<160x256xf32> -> vector<160x256xf32>
    %c0_38 = arith.constant 0 : index
    %c0_39 = arith.constant 0 : index
    %40 = vector.load %arg3[%c0_38, %c0_39] : memref<32x256xf32, #tpu.memory_space<vmem>>, vector<32x256xf32>
    %cst_40 = arith.constant dense<0.000000e+00> : vector<160x256xf32>
    %41 = tpu.matmul %1, %40, %cst_40 {dimension_numbers = #tpu.dot_dimension_numbers<[1], [0], [0], [1], [0, 0, 1, 1], [], []>} : vector<160x32xf32>, vector<32x256xf32>, vector<160x256xf32> -> vector<160x256xf32>
    %42 = arith.mulf %41, %39 : vector<160x256xf32>
    %43 = arith.mulf %42, %37 : vector<160x256xf32>
    %c0_41 = arith.constant 0 : index
    %c0_42 = arith.constant 0 : index
    %c0_43 = arith.constant 0 : index
    %44 = vector.load %arg13[%c0_41, %c0_42, %c0_43] : memref<1x160x256xf32, #tpu.memory_space<vmem>>, vector<1x160x256xf32>
    %45 = vector.shape_cast %44 : vector<1x160x256xf32> to vector<160x256xf32>
    %46 = vector.shape_cast %43 : vector<160x256xf32> to vector<1x160x256xf32>
    tpu.vector_store %arg13[%c0_41, %c0_42, %c0_43], %46 {strides = array<i32>} : memref<1x160x256xf32, #tpu.memory_space<vmem>>, vector<1x160x256xf32>,
    return
  }
  func.func @transform_0(%arg0: i32) -> i32 {
    %c0_i32 = arith.constant 0 : i32
    %c0_i32_0 = arith.constant 0 : i32
    return %c0_i32 : i32
  }
  func.func @transform_1(%arg0: i32) -> (i32, i32) {
    %c0_i32 = arith.constant 0 : i32
    %c0_i32_0 = arith.constant 0 : i32
    %c0_i32_1 = arith.constant 0 : i32
    return %c0_i32, %c0_i32_0 : i32, i32
  }
  func.func @transform_2(%arg0: i32) -> (i32, i32) {
    %c0_i32 = arith.constant 0 : i32
    %c0_i32_0 = arith.constant 0 : i32
    %c0_i32_1 = arith.constant 0 : i32
    return %c0_i32, %c0_i32_0 : i32, i32
  }
  func.func @transform_3(%arg0: i32) -> (i32, i32) {
    %c0_i32 = arith.constant 0 : i32
    %c0_i32_0 = arith.constant 0 : i32
    %c0_i32_1 = arith.constant 0 : i32
    return %c0_i32, %c0_i32_0 : i32, i32
  }
  func.func @transform_4(%arg0: i32) -> (i32, i32) {
    %c0_i32 = arith.constant 0 : i32
    %c0_i32_0 = arith.constant 0 : i32
    %c0_i32_1 = arith.constant 0 : i32
    return %c0_i32, %c0_i32_0 : i32, i32
  }
  func.func @transform_5(%arg0: i32) -> (i32, i32) {
    %c0_i32 = arith.constant 0 : i32
    %c0_i32_0 = arith.constant 0 : i32
    %c0_i32_1 = arith.constant 0 : i32
    return %c0_i32, %c0_i32_0 : i32, i32
  }
  func.func @transform_6(%arg0: i32) -> (i32, i32) {
    %c0_i32 = arith.constant 0 : i32
    %c0_i32_0 = arith.constant 0 : i32
    %c0_i32_1 = arith.constant 0 : i32
    return %c0_i32, %c0_i32_0 : i32, i32
  }
  func.func @transform_7(%arg0: i32) -> (i32, i32) {
    %c0_i32 = arith.constant 0 : i32
    %c0_i32_0 = arith.constant 0 : i32
    %c0_i32_1 = arith.constant 0 : i32
    return %c0_i32, %c0_i32_0 : i32, i32
  }
  func.func @transform_8(%arg0: i32) -> (i32, i32) {
    %c0_i32 = arith.constant 0 : i32
    %c0_i32_0 = arith.constant 0 : i32
    %c0_i32_1 = arith.constant 0 : i32
    return %c0_i32, %c0_i32_0 : i32, i32
  }
  func.func @transform_9(%arg0: i32) -> (i32, i32) {
    %c0_i32 = arith.constant 0 : i32
    %c0_i32_0 = arith.constant 0 : i32
    %c0_i32_1 = arith.constant 0 : i32
    return %c0_i32, %c0_i32_0 : i32, i32
  }
  func.func @transform_10(%arg0: i32) -> (i32, i32, i32) {
    %c0_i32 = arith.constant 0 : i32
    %c0_i32_0 = arith.constant 0 : i32
    %c0_i32_1 = arith.constant 0 : i32
    return %arg0, %c0_i32, %c0_i32_0 : i32, i32, i32
  }
  func.func @transform_11(%arg0: i32) -> (i32, i32, i32) {
    %c0_i32 = arith.constant 0 : i32
    %c0_i32_0 = arith.constant 0 : i32
    %c0_i32_1 = arith.constant 0 : i32
    return %arg0, %c0_i32, %c0_i32_0 : i32, i32, i32
  }
  func.func @transform_12(%arg0: i32) -> (i32, i32, i32) {
    %c0_i32 = arith.constant 0 : i32
    %c0_i32_0 = arith.constant 0 : i32
    %c0_i32_1 = arith.constant 0 : i32
    return %arg0, %c0_i32, %c0_i32_0 : i32, i32, i32
  }
  func.func @transform_13(%arg0: i32) -> (i32, i32, i32) {
    %c0_i32 = arith.constant 0 : i32
    %c0_i32_0 = arith.constant 0 : i32
    %c0_i32_1 = arith.constant 0 : i32
    return %arg0, %c0_i32, %c0_i32_0 : i32, i32, i32
  }
}

</mosaic_0001>

<bundles_post_ra>
// kernel: tpu_custom_call.1
= control target key start
LH: loop header
LB: loop body
LE: loop exit
PB: predicated region body
PF: predicated region fallthrough
CT: control target
= control target key end

     0   :  { %s4011_s0 = inlined_call_operand.<no memory space> [shape: f32[1], index: 0, kind: input, shape index: {}]   ;;  %s4012_s1 = inlined_call_operand.vmem [shape: f32[32,32], index: 1, kind: input, shape index: {}]   ;;  %s4013_s2 = inlined_call_operand.vmem [shape: f32[32,256], index: 2, kind: input, shape index: {}]   ;;  %s4014_s3 = inlined_call_operand.vmem [shape: f32[8,256], index: 3, kind: input, shape index: {}]   ;;  %s4015_s4 = inlined_call_operand.vmem [shape: f32[256,8], index: 4, kind: input, shape index: {}]   ;;  %s4016_s5 = inlined_call_operand.vmem [shape: f32[32,160], index: 5, kind: input, shape index: {}]   ;;  %s4017_s6 = inlined_call_operand.vmem [shape: f32[4,20], index: 6, kind: input, shape index: {}]   ;;  %s4018_s7 = inlined_call_operand.vmem [shape: f32[32,4], index: 7, kind: input, shape index: {}]   ;;  %s4019_s8 = inlined_call_operand.vmem [shape: f32[160,20], index: 8, kind: input, shape index: {}]   ;;  %s4020_s9 = inlined_call_operand.vmem [shape: f32[160,32], index: 9, kind: input, shape index: {}]   ;;  %s4021_s10 = inlined_call_operand.vmem [shape: f32[2,20,256], index: 10, kind: input, shape index: {}]   ;;  %s4022_s11 = inlined_call_operand.vmem [shape: f32[2,160,32], index: 11, kind: input, shape index: {}]   ;;  %s4023_s12 = inlined_call_operand.hbm [shape: f32[2,160,256], index: 12, kind: output, shape index: {0}]   ;;  %s4024_s13 = inlined_call_operand.vmem [shape: f32[2,32,8], index: 13, kind: output, shape index: {1}]  }
   0x1   :  { %4025 = sst [smem:[#allocation31_spill]] %s4012_s1 }
   0x2   :  { %4026 = sst [smem:[#allocation32_spill]] %s4017_s6 }
   0x3   :  { %4027 = sst [smem:[#allocation33_spill]] %s4021_s10 }
   0x4   :  { %19 = sst [smem:[#allocation2]] %s4011_s0 }
   0x5   :  { %20 = vsyncpa [#allocation4], 0 }
   0x6   :  { %22 = vsyncpa [#allocation4 + $0x1], 0  ;;  %s2995_s27 = smov 0   ;;  %s2997_s28 = smov 0  }
   0x7   :  { %s2999_s29 = smov 0   ;;  %s3001_s30 = smov 0  }
   0x8 LB: > { %s3016_s0 = sadd.s32 4294967295, %s2915_s30   ;;  %s2445_s14 = sadd.s32 4294967294, %s2915_s30   ;;  %s2915_s30 = sphi %s3001_s30, %s4086_s30   ;;  %s2911_s29 = sphi %s2999_s29, %s4085_s29   ;;  %s2907_s28 = sphi %s2997_s28, %s4084_s28   ;;  %s2903_s27 = sphi %s2995_s27, %s4083_s27  }
   0x9   : > { %s3020_s15 = sadd.s32 1, %s2915_s30   ;;  %s297_s16 = sadd.s32 1, %s2911_s29 }
   0xa   : > { %s294_s17 = ssub.s32 %s2915_s30, %s3020_s15  ;;  %p307_p0 = scmp.ne.s32.totalorder %s2911_s29, %s2907_s28 }
   0xb   : > { %p295_p1 = scmp.eq.s32.totalorder %s294_s17, 0  ;;  %p308_p2 = scmp.eq.s32.totalorder %s3016_s0, 1 }
   0xc   : > { %p313_p3 = scmp.ne.s32.totalorder %s2907_s28, %s2903_s27  ;;  %p314_p4 = scmp.eq.s32.totalorder %s2445_s14, 1 }
   0xd   : > { %s3031_s18 = scalar_select %p295_p1, %s2911_s29, %s297_s16  }
   0xe   : > { %p3033_p5 = por %p308_p2, %p307_p0  ;;  %p3037_p6 = por %p314_p4, %p313_p3 }
   0xf   : > { %p2448_p7 = scmp.ge.s32.totalorder %s2915_s30, 1  ;;  %p404_p8 = scmp.lt.s32.totalorder %s2915_s30, 3 }
  0x11   : > { %p405_p9 = pnand %p2448_p7, %p404_p8 }
  0x13   : > { %408 = sbr.rel (%p405_p9) target bundleno = 1888 (0x760), region = 68 }
  0x1a   : > { %p458_p10 = scmp.lt.s32.totalorder %s3016_s0, 1  ;;  %v500_v0 = vld [vmem:[%s4016_s5 + $0x8] sm:$0xff]  ;;  %vm507_vm0 = vcmask 261120   ;;  %v2917_v1 = vmov 0.0|0.0   ;;  %v2918_v2 = vmov 0.0   ;;  %s4030_s10 = sld [smem:[#allocation33_spill]] }
  0x1b   : > { %2688 = vmatprep.subr.bf16.mxu0 %v2917_v1  ;;  %2453 = vmatprep.mubr.msk.f32.mxu0 %vm507_vm0, %v500_v0  ;;  %vm610_vm1 = vcmask 1043456   ;;  %s4031_s1 = sld [smem:[#allocation31_spill]]  ;;  %s4032_s6 = sld [smem:[#allocation32_spill]]  ;;  %vm606_vm2 = vcmask 162816   ;;  %v499_v45 = vld [vmem:[%s4016_s5] sm:$0xff]  ;;  %v502_v46 = vld [vmem:[%s4016_s5 + $0x18] sm:$0xff] }
  0x1c   : > { %s3050_s23 = scalar_select %p458_p10, %s3016_s0, 1  ;;  %681 = vmatprep.mubr.f32.mxu1 %v2918_v2  ;;  %v501_v47 = vld [vmem:[%s4016_s5 + $0x10] sm:$0xff]  ;;  %v504_v48 = vld [vmem:[%s4016_s5 + $0x28] sm:$0xff]  ;;  %v503_v49 = vld [vmem:[%s4016_s5 + $0x20] sm:$0xff]  ;;  %vm902_vm3 = vcmask 31744   ;;  %vm1135_vm4 = vcmask 64512  }
  0x1d   : > { %v506_v50 = vld [vmem:[%s4016_s5 + $0x38] sm:$0xff]  ;;  %v505_v51 = vld [vmem:[%s4016_s5 + $0x30] sm:$0xff]  ;;  %v790_v55 = vld [vmem:[%s4013_s2 + $0x8] sm:$0xff]  ;;  %s2793_s21 = smul.u32 5120, %s3016_s0 }
  0x1e   : > { %s2792_s24 = smul.u32 160, %s3050_s23  ;;  %v792_v56 = vld [vmem:[%s4013_s2 + $0x18] sm:$0xff]  ;;  %v789_v60 = vld [vmem:[%s4013_s2] sm:$0xff]  ;;  %v791_v61 = vld [vmem:[%s4013_s2 + $0x10] sm:$0xff]  ;;  %s2559_s17 = sshll.u32 %s3050_s23, 5 }
  0x1f   : > { %s2791_s16 = smul.u32 48, %s3050_s23  ;;  %v3212_v57 = vpack.c.bf16 %v792_v56, %v790_v55  ;;  %v794_v63 = vld [vmem:[%s4013_s2 + $0x28] sm:$0xff]  ;;  %v796_v0 = vld [vmem:[%s4013_s2 + $0x38] sm:$0xff]  ;;  %s3961_s25 = scalar_lea.hbm %s4023_s12, %s2793_s21 }
  0x20   : > { %s3057_s14 = scalar_lea.vmem %s4022_s11, %s2792_s24  ;;  %s472_s24 = scalar_lea.vmem %s4024_s13, %s2559_s17 }
  0x21   : > { %v3061_v3 = vld [vmem:[%s3057_s14] sm:$0xff]  ;;  %v3064_v4 = vld [vmem:[%s3057_s14 + $0x8] sm:$0xff]  ;;  %v3067_v5 = vld [vmem:[%s3057_s14 + $0x10] sm:$0xff]  ;;  %s462_s22 = scalar_lea.vmem %s4030_s10, %s2791_s16  ;;  %s1184_s16 = sld [smem:[#allocation2]] }
  0x22   : > { %v2689_v6 = vpack.c.bf16 %v3064_v4, %v3061_v3  ;;  %v3072_v7 = vld [vmem:[%s3057_s14 + $0x18] sm:$0xff]  ;;  %v3081_v9 = vld [vmem:[%s3057_s14 + $0x20] sm:$0xff]  ;;  %v3084_v10 = vld [vmem:[%s3057_s14 + $0x28] sm:$0xff]  ;;  %s448_s10 = sand.u32 1, %s2907_s28  }
  0x23   : > { %v2692_v8 = vpack.c.bf16 %v3072_v7, %v3067_v5  ;;  %v494_v11 = vld [vmem:[%s462_s22 + $0x8] sm:$0xff]  ;;  %v2695_v12 = vpack.c.bf16 %v3084_v10, %v3081_v9  ;;  %v496_v13 = vld [vmem:[%s462_s22 + $0x18] sm:$0xff]  ;;  %v493_v14 = vld [vmem:[%s462_s22] sm:$0xff]  ;;  %s3970_s0 = scalar_lea.sflag [#allocation4], %s448_s10 }
  0x24   : > { %2690 = vmatpush1.bf16.msra.mxu0 %v2689_v6  ;;  %v495_v15 = vld [vmem:[%s462_s22 + $0x10] sm:$0xff]  ;;  %v3093_v17 = vld [vmem:[%s3057_s14 + $0x38] sm:$0xff]  ;;  %v3095_v18 = vpack.c.bf16 %v496_v13, %v494_v11  ;;  %v3099_v20 = vld [vmem:[%s462_s22 + $0x28] sm:$0xf]  ;;  %v3228_v6 = vpack.c.bf16 %v791_v61, %v789_v60 }
  0x25   : > { %2691 = vmatprep.subr.bf16.mxu0 %v2917_v1  ;;  %v3090_v16 = vld [vmem:[%s3057_s14 + $0x30] sm:$0xff]  ;;  %v3097_v19 = vpack.c.bf16 %v495_v15, %v493_v14  ;;  %v688_v21 = vld [vmem:[%s4031_s1] sm:$0xff]  ;;  %v689_v22 = vld [vmem:[%s4031_s1 + $0x8] sm:$0xff] }
  0x26   : > { %2719 = vmatprep.subr.bf16.mxu1 %v3095_v18  ;;  %v2698_v23 = vpack.c.bf16 %v3093_v17, %v3090_v16  ;;  %v3113_v24 = vld [vmem:[%s3057_s14 + $0x40] sm:$0xff]  ;;  %v3116_v25 = vld [vmem:[%s3057_s14 + $0x48] sm:$0xff]  ;;  %v2722_v28 = vpack.c.bf16 %v689_v22, %v688_v21  ;;  %v3131_v30 = vld [vmem:[%s3057_s14 + $0x50] sm:$0xff] }
  0x27   : > { %2721 = vmatpush1.bf16.msra.mxu1 %v3097_v19  ;;  %v3120_v26 = vld [vmem:[%s462_s22 + $0x20] sm:$0xf]  ;;  %v2701_v29 = vpack.c.bf16 %v3116_v25, %v3113_v24  ;;  %v3134_v31 = vld [vmem:[%s3057_s14 + $0x58] sm:$0xff]  ;;  %v3144_v34 = vld [vmem:[%s3057_s14 + $0x68] sm:$0xff] }
  0x28   : > { %2693 = vmatpush1.bf16.msra.mxu0 %v2692_v8  ;;  %2457 = vmatprep.subr.msk.mxu1 %vm610_vm1, %v3099_v20  ;;  %v605_v27 = vld [vmem:[%s4032_s6] sm:$0xf]  ;;  %v2704_v32 = vpack.c.bf16 %v3134_v31, %v3131_v30  ;;  %v3150_v36 = vld [vmem:[%s3057_s14 + $0x70] sm:$0xff]  ;;  %v3153_v37 = vld [vmem:[%s3057_s14 + $0x78] sm:$0xff]  ;;  %v3230_v8 = vpack.c.bf16 %v796_v0, %v794_v63 }
  0x29   : > { %2694 = vmatprep.subr.bf16.mxu0 %v2917_v1  ;;  %v3141_v33 = vld [vmem:[%s3057_s14 + $0x60] sm:$0xff]  ;;  %v2710_v38 = vpack.c.bf16 %v3153_v37, %v3150_v36  ;;  %v3162_v40 = vld [vmem:[%s3057_s14 + $0x88] sm:$0xff]  ;;  %v3168_v42 = vld [vmem:[%s3057_s14 + $0x90] sm:$0xff] }
  0x2a   : > { %v2707_v35 = vpack.c.bf16 %v3144_v34, %v3141_v33  ;;  %v3159_v39 = vld [vmem:[%s3057_s14 + $0x80] sm:$0xff]  ;;  %v3171_v43 = vld [vmem:[%s3057_s14 + $0x98] sm:$0xff]  ;;  %v690_v52 = vld [vmem:[%s4031_s1 + $0x10] sm:$0xff]  ;;  %s2919_s14 = smov [#allocation3]  }
  0x2b   : > { %2458 = vmatpush1.msk.msra.mxu1 %vm610_vm1, %v3120_v26  ;;  %v2713_v41 = vpack.c.bf16 %v3162_v40, %v3159_v39  ;;  %v2716_v44 = vpack.c.bf16 %v3171_v43, %v3168_v42  ;;  %v691_v53 = vld [vmem:[%s4031_s1 + $0x18] sm:$0xff]  ;;  %v793_v11 = vld [vmem:[%s4013_s2 + $0x20] sm:$0xff]  ;;  %v900_v63 = vld [vmem:[%s4018_s7 + $0x10] sm:$0xff]  ;;  %s2857_s1 = sshll.u32 %s2919_s14, 4  ;;  %s2858_s1 = int_to_ptr.vmem [resolvable:$false] %s2857_s1 }
  0x2c   : > { %2696 = vmatpush1.bf16.msra.mxu0 %v2695_v12  ;;  %2459 = vmatmul.mubr.msk.f32.vlgmr.msra.gmra.mrb[0].mxu1 %vm606_vm2, %v605_v27  ;;  %v2726_v54 = vpack.c.bf16 %v691_v53, %v690_v52  ;;  %v795_v12 = vld [vmem:[%s4013_s2 + $0x30] sm:$0xff]  ;;  %v1022_v53 = vld [vmem:[%s4015_s4 + $0x20] sm:$0xff]  ;;  %v901_v0 = vld [vmem:[%s4018_s7 + $0x18] sm:$0xff]  ;;  %s2859_s6 = scalar_lea.vmem %s2858_s1, 10240 }
  0x2d   : > { %2697 = vmatprep.subr.bf16.mxu0 %v2917_v1  ;;  %2723 = vmatprep.subr.bf16.mxu1 %v2722_v28  ;;  %v3240_v15 = vpack.c.bf16 %v795_v12, %v793_v11  ;;  %v1041_v11 = vld [vmem:[%s4015_s4 + $0xb8] sm:$0xff] }
  0x2e   : > { %2725 = vmatpush3.bf16.msra.mxu1 %v2722_v28  ;;  %v1034_v28 = vld [vmem:[%s4015_s4 + $0x80] sm:$0xff] }
  0x2f   : > { %2727 = vmatprep.subr.bf16.mxu1 %v2726_v54 }
  0x30   : > { %2699 = vmatpush1.bf16.msra.mxu0 %v2698_v23 }
  0x31   : > { %2700 = vmatprep.subr.bf16.mxu0 %v2917_v1 }
  0x32   : > { %2729 = vmatpush3.bf16.msra.mxu1 %v2726_v54  ;;  %v1023_v54 = vld [vmem:[%s4015_s4 + $0x28] sm:$0xff] }
  0x33   : > { %2731 = vmatprep.subr.bf16.mxu1 %v3212_v57  ;;  %v2748_v55 = vpack.c.bf16 %v1023_v54, %v1022_v53  ;;  %v1048_v53 = vld [vmem:[%s4015_s4 + $0xf0] sm:$0xff]  ;;  %v1049_v54 = vld [vmem:[%s4015_s4 + $0xf8] sm:$0xff] }
  0x34   : > { %2702 = vmatpush1.bf16.msra.mxu0 %v2701_v29  ;;  %v1035_v29 = vld [vmem:[%s4015_s4 + $0x88] sm:$0xff] }
  0x35   : > { %2703 = vmatprep.subr.bf16.mxu0 %v2917_v1 }
  0x38   : > { %2705 = vmatpush1.bf16.msra.mxu0 %v2704_v32  ;;  %v1018_v32 = vld [vmem:[%s4015_s4] sm:$0xff] }
  0x39   : > { %2706 = vmatprep.subr.bf16.mxu0 %v2917_v1 }
  0x3c   : > { %2708 = vmatpush1.bf16.msra.mxu0 %v2707_v35  ;;  %v2738_v35 = vpack.c.bf16 %v1035_v29, %v1034_v28  ;;  %v1026_v28 = vld [vmem:[%s4015_s4 + $0x40] sm:$0xff]  ;;  %v1027_v29 = vld [vmem:[%s4015_s4 + $0x48] sm:$0xff] }
  0x3d   : > { %2709 = vmatprep.subr.bf16.mxu0 %v2917_v1 }
  0x40   : > { %2711 = vmatpush1.bf16.msra.mxu0 %v2710_v38  ;;  %v1019_v38 = vld [vmem:[%s4015_s4 + $0x8] sm:$0xff] }
  0x41   : > { %2712 = vmatprep.subr.bf16.mxu0 %v2917_v1 }
  0x44   : > { %2714 = vmatpush1.bf16.msra.mxu0 %v2713_v41  ;;  %v1036_v41 = vld [vmem:[%s4015_s4 + $0x90] sm:$0xff] }
  0x45   : > { %2715 = vmatprep.subr.bf16.mxu0 %v2917_v1 }
  0x48   : > { %2717 = vmatpush1.bf16.msra.mxu0 %v2716_v44  ;;  %v1037_v44 = vld [vmem:[%s4015_s4 + $0x98] sm:$0xff] }
  0x49   : > { %2739 = vmatprep.subr.bf16.mxu0 %v2738_v35  ;;  %v1044_v35 = vld [vmem:[%s4015_s4 + $0xd0] sm:$0xff] }
  0x4b   : > { %585 = vmatmul.mubr.f32.vlgmr.msra.gmra.mrb[0].mxu0 %v499_v45  ;;  %v2740_v45 = vpack.c.bf16 %v1019_v38, %v1018_v32  ;;  %v2756_v32 = vpack.c.bf16 %v1027_v29, %v1026_v28  ;;  %v1045_v38 = vld [vmem:[%s4015_s4 + $0xd8] sm:$0xff] }
  0x4c   : > { %2454 = vmatprep.mubr.msk.f32.mxu0 %vm507_vm0, %v502_v46  ;;  %v2742_v46 = vpack.c.bf16 %v1037_v44, %v1036_v41  ;;  %v2758_v41 = vpack.c.bf16 %v1045_v38, %v1044_v35  ;;  %v1028_v44 = vld [vmem:[%s4015_s4 + $0x50] sm:$0xff] }
  0x4d   : > { %2741 = vmatpush3.bf16.msra.mxu0 %v2740_v45  ;;  %v1029_v45 = vld [vmem:[%s4015_s4 + $0x58] sm:$0xff] }
  0x4e   : > { %2743 = vmatprep.subr.bf16.mxu0 %v2742_v46  ;;  %v2760_v46 = vpack.c.bf16 %v1029_v45, %v1028_v44 }
  0x4f   : > { %590 = vmatmul.mubr.f32.gmra.mrb[2].mxu0 %v501_v47  ;;  %v1020_v47 = vld [vmem:[%s4015_s4 + $0x10] sm:$0xff] }
  0x50   : > { %2455 = vmatprep.mubr.msk.f32.mxu0 %vm507_vm0, %v504_v48  ;;  %v1021_v48 = vld [vmem:[%s4015_s4 + $0x18] sm:$0xff] }
  0x53   : > { %595 = vmatmul.mubr.f32.gmra.mrb[4].mxu0 %v503_v49  ;;  %v1038_v49 = vld [vmem:[%s4015_s4 + $0xa0] sm:$0xff] }
  0x54   : > { %2456 = vmatprep.mubr.msk.f32.mxu0 %vm507_vm0, %v506_v50  ;;  %v1039_v50 = vld [vmem:[%s4015_s4 + $0xa8] sm:$0xff] }
  0x55   : > { %v2746_v52 = vpack.c.bf16 %v1039_v50, %v1038_v49  ;;  %v1030_v50 = vld [vmem:[%s4015_s4 + $0x60] sm:$0xff] }
  0x57   : > { %600 = vmatmul.mubr.f32.gmra.mrb[6].mxu0 %v505_v51  ;;  %v2744_v51 = vpack.c.bf16 %v1021_v48, %v1020_v47  ;;  %v1046_v47 = vld [vmem:[%s4015_s4 + $0xe0] sm:$0xff]  ;;  %v1047_v48 = vld [vmem:[%s4015_s4 + $0xe8] sm:$0xff] }
  0x58   : > { %v2762_v49 = vpack.c.bf16 %v1047_v48, %v1046_v47 }
  0x59   : > { %2745 = vmatpush3.bf16.msra.mxu0 %v2744_v51  ;;  %v1031_v51 = vld [vmem:[%s4015_s4 + $0x68] sm:$0xff] }
  0x5a   : > { %2747 = vmatprep.subr.bf16.mxu0 %v2746_v52  ;;  %v2764_v52 = vpack.c.bf16 %v1031_v51, %v1030_v50 }
  0x5d   : > { %2749 = vmatpush3.bf16.msra.mxu0 %v2748_v55  ;;  %v2766_v55 = vpack.c.bf16 %v1049_v54, %v1048_v53 }
  0xff   : > { %v683_v58 = vpop.f32.mrb[0].mxu1 }
 0x100   : > { %v685_v59 = vpop.f32.mrb[1].mxu1 }
 0x11e   : > { %v586_v62 = vpop.f32.mrb[0].mxu0 }
 0x11f   : > { %v588_v1 = vpop.f32.mrb[1].mxu0  ;;  %2644 = vmatprep.mubr.msk.f32.mxu1 %vm507_vm0, %v586_v62  ;;  %v899_v62 = vld [vmem:[%s4018_s7 + $0x8] sm:$0xff] }
 0x120   : > { %v1040_v1 = vld [vmem:[%s4015_s4 + $0xb0] sm:$0xff] }
 0x121   : > { %v2750_v12 = vpack.c.bf16 %v1041_v11, %v1040_v1 }
 0x122   : > { %v591_v13 = vpop.f32.mrb[2].mxu0 }
 0x123   : > { %v593_v14 = vpop.f32.mrb[3].mxu0  ;;  %2645 = vmatmul.mubr.msk.f32.vlgmr.msra.gmra.mrb[2].mxu1 %vm507_vm0, %v591_v13  ;;  %v1024_v13 = vld [vmem:[%s4015_s4 + $0x30] sm:$0xff]  ;;  %2751 = vmatprep.subr.bf16.mxu0 %v2750_v12 }
 0x124   : > { %2733 = vmatpush1.bf16.msra.mxu1 %v3228_v6  ;;  %v1025_v14 = vld [vmem:[%s4015_s4 + $0x38] sm:$0xff] }
 0x125   : > { %2735 = vmatprep.subr.bf16.mxu1 %v3230_v8 }
 0x126   : > { %v596_v21 = vpop.f32.mrb[4].mxu0 }
 0x127   : > { %v598_v22 = vpop.f32.mrb[5].mxu0  ;;  %2647 = vmatprep.mubr.msk.f32.mxu1 %vm507_vm0, %v596_v21  ;;  %v2752_v21 = vpack.c.bf16 %v1025_v14, %v1024_v13 }
 0x128   : > { %2737 = vmatpush1.bf16.msra.mxu1 %v3240_v15  ;;  %v1042_v22 = vld [vmem:[%s4015_s4 + $0xc0] sm:$0xff] }
 0x129   : > { %2468 = vmatprep.subr.msk.mxu1 %vm610_vm1, %v685_v59  ;;  %2753 = vmatpush3.bf16.msra.mxu0 %v2752_v21 }
 0x12a   : > { %v601_v23 = vpop.f32.mrb[6].mxu0 }
 0x12b   : > { %v603_v27 = vpop.f32.mrb[7].mxu0  ;;  %2648 = vmatmul.mubr.msk.f32.gmra.mrb[4].mxu1 %vm507_vm0, %v601_v23  ;;  %v1043_v23 = vld [vmem:[%s4015_s4 + $0xc8] sm:$0xff] }
 0x12c   : > { %873 = vmatprep.mubr.f32.mxu1 %v2918_v2  ;;  %v2754_v27 = vpack.c.bf16 %v1043_v23, %v1042_v22 }
 0x12e   : > { %2755 = vmatprep.subr.bf16.mxu0 %v2754_v27 }
 0x12f   : > { %2757 = vmatpush3.bf16.msra.mxu0 %v2756_v32 }
 0x130   : > { %2759 = vmatprep.subr.bf16.mxu0 %v2758_v41 }
 0x133   : > { %2761 = vmatpush3.bf16.msra.mxu0 %v2760_v46 }
 0x134   : > { %2763 = vmatprep.subr.bf16.mxu0 %v2762_v49 }
 0x137   : > { %2765 = vmatpush3.bf16.msra.mxu0 %v2764_v52 }
 0x138   : > { %2767 = vmatprep.subr.bf16.mxu0 %v2766_v55 }
 0x1f6   : > { %v2646_v56 = vpop.f32.mrb[2].mxu1 }
 0x1f7   : > { %v770_v59 = vpop.f32.mrb[3].mxu1 }
 0x1f8   : > { %2464 = vmatmul.mubr.msk.f32.vlgmr.msra.gmra.mrb[6].mxu1 %vm507_vm0, %v770_v59  ;;  %v1033_v59 = vld [vmem:[%s4015_s4 + $0x78] sm:$0xff] }
 0x1f9   : > { %2469 = vmatpush1.msk.msra.mxu1 %vm610_vm1, %v683_v58  ;;  %879 = vmatprep.mubr.f32.mxu1 %v2918_v2  ;;  %v898_v58 = vld [vmem:[%s4018_s7] sm:$0xff] }
 0x1fc   : > { %2465 = vmatmul.mubr.msk.f32.gmra.mrb[8].mxu1 %vm507_vm0, %v2646_v56  ;;  %v1032_v56 = vld [vmem:[%s4015_s4 + $0x70] sm:$0xff] }
 0x1fd   : > { %885 = vmatprep.mubr.f32.mxu1 %v2918_v2 }
 0x1fe   : > { %v2649_v60 = vpop.f32.mrb[4].mxu1 }
 0x1ff   : > { %v780_v61 = vpop.f32.mrb[5].mxu1 }
 0x200   : > { %2466 = vmatmul.mubr.msk.f32.gmra.mrb[10].mxu1 %vm507_vm0, %v780_v61 }
 0x201   : > { %891 = vmatprep.mubr.f32.mxu1 %v2918_v2 }
 0x204   : > { %2467 = vmatmul.mubr.msk.f32.gmra.mrb[12].mxu1 %vm507_vm0, %v2649_v60  ;;  %v2768_v60 = vpack.c.bf16 %v1033_v59, %v1032_v56 }
 0x205   : > { %985 = vmatprep.mubr.f32.mxu1 %v2918_v2 }
 0x206   : > { %2769 = vmatpush3.bf16.msra.mxu0 %v2768_v60 }
 0x208   : > { %2470 = vmatmul.mubr.msk.f32.vlgmr.msra.gmra.mrb[14].mxu1 %vm902_vm3, %v898_v58 }
 0x209   : > { %991 = vmatprep.mubr.f32.mxu1 %v2918_v2 }
 0x20c   : > { %2471 = vmatmul.mubr.msk.f32.gmra.mrb[16].mxu1 %vm902_vm3, %v899_v62 }
 0x20d   : > { %997 = vmatprep.mubr.f32.mxu1 %v2918_v2 }
 0x210   : > { %2472 = vmatmul.mubr.msk.f32.gmra.mrb[18].mxu1 %vm902_vm3, %v900_v63 }
 0x211   : > { %1003 = vmatprep.mubr.f32.mxu1 %v2918_v2 }
 0x214   : > { %2473 = vmatmul.mubr.msk.f32.gmra.mrb[20].mxu1 %vm902_vm3, %v901_v0 }
 0x215   : > { %1565 = vmatprep.mubr.f32.mxu1 %v2918_v2 }
 0x2cb   : > { %v875_v61 = vpop.f32.mrb[6].mxu1 }
 0x2cc   : > { %v877_v58 = vpop.f32.mrb[7].mxu1 }
 0x2cf   : > { %v881_v62 = vpop.f32.mrb[8].mxu1 }
 0x2d0   : > { %v883_v63 = vpop.f32.mrb[9].mxu1 }
 0x2d3   : > { %v887_v0 = vpop.f32.mrb[10].mxu1 }
 0x2d4   : > { %v889_v1 = vpop.f32.mrb[11].mxu1 }
 0x2d7   : > { %v893_v11 = vpop.f32.mrb[12].mxu1 }
 0x2d8   : > { %v895_v12 = vpop.f32.mrb[13].mxu1 }
 0x2db   : > { %v987_v13 = vpop.f32.mrb[14].mxu1 }
 0x2dc   : > { %v1010_v14 = vmul.f32 %v987_v13, %v875_v61  ;;  %v989_v21 = vpop.f32.mrb[15].mxu1 }
 0x2dd   : > { %v1011_v22 = vmul.f32 %v989_v21, %v877_v58 }
 0x2df   : > { %v993_v23 = vpop.f32.mrb[16].mxu1  ;;  %1114 = vmatprep.mubr.f32.mxu0 %v1011_v22 }
 0x2e0   : > { %v1012_v27 = vmul.f32 %v993_v23, %v881_v62  ;;  %v995_v28 = vpop.f32.mrb[17].mxu1  ;;  %1115 = vmatmul.mubr.f32.vlgmr.msra.gmra.mrb[8].mxu0 %v1010_v14 }
 0x2e1   : > { %v1013_v29 = vmul.f32 %v995_v28, %v883_v63 }
 0x2e3   : > { %v999_v32 = vpop.f32.mrb[18].mxu1  ;;  %1119 = vmatprep.mubr.f32.mxu0 %v1013_v29 }
 0x2e4   : > { %v1014_v35 = vmul.f32 %v999_v32, %v887_v0  ;;  %v1001_v38 = vpop.f32.mrb[19].mxu1  ;;  %1120 = vmatmul.mubr.f32.gmra.mrb[10].mxu0 %v1012_v27 }
 0x2e5   : > { %v1015_v41 = vmul.f32 %v1001_v38, %v889_v1 }
 0x2e7   : > { %v1005_v44 = vpop.f32.mrb[20].mxu1  ;;  %1124 = vmatprep.mubr.f32.mxu0 %v1015_v41 }
 0x2e8   : > { %v1016_v45 = vmul.f32 %v1005_v44, %v893_v11  ;;  %v1007_v46 = vpop.f32.mrb[21].mxu1  ;;  %1125 = vmatmul.mubr.f32.gmra.mrb[12].mxu0 %v1014_v35 }
 0x2e9   : > { %v1017_v47 = vmul.f32 %v1007_v46, %v895_v12 }
 0x2eb   : > { %1129 = vmatprep.mubr.f32.mxu0 %v1017_v47 }
 0x2ec   : > { %1130 = vmatmul.mubr.f32.gmra.mrb[14].mxu0 %v1016_v45 }
 0x3b3   : > { %v2600_v48 = vpop.f32.mrb[8].mxu0 }
 0x3b4   : > { %v2601_v49 = vpop.f32.mrb[9].mxu0 }
 0x3b5   : > { %v2602_v50 = vadd.f32 %v2601_v49, %v2600_v48  ;;  %v1194_v49 = vld [vmem:[%s4020_s9] sm:$0xff] }
 0x3b6   : > { %2658 = vmatprep.mubr.msk.f32.mxu0 %vm507_vm0, %v1194_v49  ;;  %v1209_v49 = vld [vmem:[%s4020_s9 + $0x78] sm:$0xff] }
 0x3b7   : > { %v2603_v51 = vpop.f32.mrb[10].mxu0  ;;  %v1136_v52 = vsel %vm1135_vm4, %v2602_v50, -inf }
 0x3b8   : > { %1137 = vmax.xlane.f32.xlu0 %v1136_v52  ;;  %v2604_v53 = vpop.f32.mrb[11].mxu0 }
 0x3b9   : > { %v2605_v54 = vadd.f32 %v2604_v53, %v2603_v51  ;;  %v1439_v51 = vld [vmem:[%s4014_s3] sm:$0xff] }
 0x3bb   : > { %v2606_v55 = vpop.f32.mrb[12].mxu0  ;;  %v1139_v56 = vsel %vm1135_vm4, %v2605_v54, -inf }
 0x3bc   : > { %1140 = vmax.xlane.f32.xlu0 %v1139_v56  ;;  %v2607_v59 = vpop.f32.mrb[13].mxu0 }
 0x3bd   : > { %v2608_v60 = vadd.f32 %v2607_v59, %v2606_v55 }
 0x3bf   : > { %v2609_v61 = vpop.f32.mrb[14].mxu0  ;;  %v1142_v58 = vsel %vm1135_vm4, %v2608_v60, -inf }
 0x3c0   : > { %1143 = vmax.xlane.f32.xlu1 %v1142_v58  ;;  %v2610_v62 = vpop.f32.mrb[15].mxu0 }
 0x3c1   : > { %v2611_v63 = vadd.f32 %v2610_v62, %v2609_v61 }
 0x3c3   : > { %v1145_v0 = vsel %vm1135_vm4, %v2611_v63, -inf }
 0x3c4   : > { %1146 = vmax.xlane.f32.xlu1 %v1145_v0 }
 0x445   : > { %v1138_v1 = vpop.xlane.xlu0 %1137 }
 0x446   : > { %v1148_v11 = vsub.f32 %v2602_v50, %v1138_v1  ;;  %v1440_v50 = vld [vmem:[%s4014_s3 + $0x8] sm:$0xff] }
 0x447   : > { %1501 = vmatprep.subr.mxu1 %v1440_v50  ;;  %v1210_v50 = vld [vmem:[%s4020_s9 + $0x80] sm:$0xff] }
 0x448   : > { %v1152_v12 = vmul.f32 1.442695, %v1148_v11  ;;  %1502 = vmatpush1.msra.mxu1 %v1439_v51  ;;  %v1211_v51 = vld [vmem:[%s4020_s9 + $0x88] sm:$0xff] }
 0x449   : > { %v1141_v13 = vpop.xlane.xlu0 %1140  ;;  %2783 = vmatprep.subr.bf16.mxu1 %v3212_v57 }
 0x44a   : > { %2837 = vpow2.f32 %v1152_v12  ;;  %v1149_v14 = vsub.f32 %v2605_v54, %v1141_v13 }
 0x44c   : > { %v1154_v21 = vmul.f32 1.442695, %v1149_v14 }
 0x44d   : > { %v1144_v22 = vpop.xlane.xlu1 %1143 }
 0x44e   : > { %2839 = vpow2.f32 %v1154_v21  ;;  %v1150_v23 = vsub.f32 %v2608_v60, %v1144_v22  ;;  %v1185_v60 = vstv %s1184_s16  ;;  %s2790_s16 = smul.u32 320, %s448_s10 }
 0x450   : > { %v1156_v27 = vmul.f32 1.442695, %v1150_v23  ;;  %s3841_s17 = scalar_lea.vmem [#allocation3], %s2790_s16 }
 0x451   : > { %v1147_v28 = vpop.xlane.xlu1 %1146  ;;  %s2343_s22 = sshll.u32 %s3841_s17, 4  ;;  %s3963_s22 = int_to_ptr.vmem [resolvable:$true] %s2343_s22 }
 0x452   : > { %2841 = vpow2.f32 %v1156_v27  ;;  %v1151_v29 = vsub.f32 %v2611_v63, %v1147_v28  ;;  %s2853_s26 = scalar_lea.vmem %s3963_s22, 5120  ;;  %p2860_p0 = scmp.lt.s32.totalorder %s3963_s22, %s2858_s1 }
 0x453   : > { %p2854_p11 = scmp.ne.s32.totalorder %s3963_s22, %s2853_s26  ;;  %p2861_p1 = scmp.lt.s32.totalorder %s2859_s6, %s2853_s26 }
 0x454   : > { %v2838_v32 = vpop.eup %2837  ;;  %v1158_v35 = vmul.f32 1.442695, %v1151_v29  ;;  %v1195_v29 = vld [vmem:[%s4020_s9 + $0x8] sm:$0xff] }
 0x455   : > { %v1160_v38 = vsel %vm1135_vm4, %v2838_v32, 0.0  ;;  %p2855_p12 = pnand %p2854_p11, %p3033_p5  ;;  %p2862_p2 = por %p2861_p1, %p2860_p0 }
 0x456   : > { %2843 = vpow2.f32 %v1158_v35  ;;  %1161 = vadd.xlane.f32.xlu0 %v1160_v38  ;;  %v1197_v35 = vld [vmem:[%s4020_s9 + $0x18] sm:$0xff]  ;;  %v1198_v38 = vld [vmem:[%s4020_s9 + $0x20] sm:$0xff] }
 0x457   : > { %p2856_p13 = pneg %p2855_p12 }
 0x458   : > { %v2840_v41 = vpop.eup %2839 }
 0x459   : > { %v1163_v44 = vsel %vm1135_vm4, %v2840_v41, 0.0  ;;  %p2863_p3 = pnand %p2862_p2, %p2856_p13 }
 0x45a   : > { %1164 = vadd.xlane.f32.xlu1 %v1163_v44  ;;  %v1204_v44 = vld [vmem:[%s4020_s9 + $0x50] sm:$0xff] }
 0x45c   : > { %v2842_v45 = vpop.eup %2841 }
 0x45d   : > { %v1166_v46 = vsel %vm1135_vm4, %v2842_v45, 0.0 }
 0x45e   : > { %1167 = vadd.xlane.f32.xlu0 %v1166_v46  ;;  %v1206_v46 = vld [vmem:[%s4020_s9 + $0x60] sm:$0xff] }
 0x460   : > { %v2844_v47 = vpop.eup %2843 }
 0x461   : > { %v1169_v48 = vsel %vm1135_vm4, %v2844_v47, 0.0 }
 0x462   : > { %1170 = vadd.xlane.f32.xlu1 %v1169_v48  ;;  %v1208_v48 = vld [vmem:[%s4020_s9 + $0x70] sm:$0xff] }
 0x4e3   : > { %v1162_v52 = vpop.xlane.xlu0 %1161 }
 0x4e4   : > { %2845 = vrcp.f32 %v1162_v52  ;;  %v1212_v52 = vld [vmem:[%s4020_s9 + $0x90] sm:$0xff] }
 0x4e7   : > { %v1165_v53 = vpop.xlane.xlu1 %1164 }
 0x4e8   : > { %2847 = vrcp.f32 %v1165_v53  ;;  %v1213_v53 = vld [vmem:[%s4020_s9 + $0x98] sm:$0xff] }
 0x4eb   : > { %v1168_v54 = vpop.xlane.xlu0 %1167 }
 0x4ec   : > { %2849 = vrcp.f32 %v1168_v54  ;;  %v1686_v54 = vld [vmem:[%s4019_s8] sm:$0xff] }
 0x4ee   : > { %v2846_v55 = vpop.eup %2845 }
 0x4ef   : > { %v1171_v56 = vpop.xlane.xlu1 %1170  ;;  %v1173_v59 = vmul.f32 %v2846_v55, %v2838_v32  ;;  %v1196_v32 = vld [vmem:[%s4020_s9 + $0x10] sm:$0xff]  ;;  %v1687_v55 = vld [vmem:[%s4019_s8 + $0x8] sm:$0xff] }
 0x4f0   : > { %2851 = vrcp.f32 %v1171_v56  ;;  %v1688_v56 = vld [vmem:[%s4019_s8 + $0x10] sm:$0xff] }
 0x4f1   : > { %1180 = vst.msk [vmem:[%s472_s24] sm:$0xff] %vm1135_vm4, %v1173_v59  ;;  %v1186_v58 = vmul.f32 %v1185_v60, %v1173_v59  ;;  %v1689_v59 = vld [vmem:[%s4019_s8 + $0x18] sm:$0xff] }
 0x4f2   : > { %v2848_v57 = vpop.eup %2847 }
 0x4f3   : > { %v1175_v61 = vmul.f32 %v2848_v57, %v2840_v41  ;;  %v1190_v0 = vadd.f32 1.0, %v1186_v58  ;;  %v1202_v41 = vld [vmem:[%s4020_s9 + $0x40] sm:$0xff]  ;;  %v1691_v57 = vld [vmem:[%s4019_s8 + $0x28] sm:$0xff]  ;;  %v1693_v58 = vld [vmem:[%s4019_s8 + $0x38] sm:$0xff] }
 0x4f5   : > { %1181 = vst.msk [vmem:[%s472_s24 + $0x8] sm:$0xff] %vm1135_vm4, %v1175_v61  ;;  %v1187_v62 = vmul.f32 %v1185_v60, %v1175_v61  ;;  %v1692_v61 = vld [vmem:[%s4019_s8 + $0x30] sm:$0xff] }
 0x4f6   : > { %v2850_v63 = vpop.eup %2849 }
 0x4f7   : > { %v1191_v1 = vadd.f32 1.0, %v1187_v62  ;;  %v1177_v11 = vmul.f32 %v2850_v63, %v2842_v45  ;;  %v1205_v45 = vld [vmem:[%s4020_s9 + $0x58] sm:$0xff]  ;;  %v1694_v62 = vld [vmem:[%s4019_s8 + $0x40] sm:$0xff]  ;;  %v1695_v63 = vld [vmem:[%s4019_s8 + $0x48] sm:$0xff] }
 0x4f9   : > { %v2770_v12 = vpack.c.bf16 %v1191_v1, %v1190_v0  ;;  %1182 = vst.msk [vmem:[%s472_s24 + $0x10] sm:$0xff] %vm1135_vm4, %v1177_v11  ;;  %v1188_v21 = vmul.f32 %v1185_v60, %v1177_v11  ;;  %v1696_v0 = vld [vmem:[%s4019_s8 + $0x50] sm:$0xff]  ;;  %v1697_v1 = vld [vmem:[%s4019_s8 + $0x58] sm:$0xff]  ;;  %v1698_v11 = vld [vmem:[%s4019_s8 + $0x60] sm:$0xff] }
 0x4fa   : > { %v2852_v13 = vpop.eup %2851 }
 0x4fb   : > { %2771 = vmatprep.subr.bf16.mxu0 %v2770_v12  ;;  %v1179_v14 = vmul.f32 %v2852_v13, %v2844_v47  ;;  %v1192_v23 = vadd.f32 1.0, %v1188_v21  ;;  %v1207_v47 = vld [vmem:[%s4020_s9 + $0x68] sm:$0xff] }
 0x4fc   : > { %2773 = vmatpush3.bf16.msra.mxu0 %v2770_v12 }
 0x4fd   : > { %1183 = vst.msk [vmem:[%s472_s24 + $0x18] sm:$0xff] %vm1135_vm4, %v1179_v14  ;;  %v1189_v22 = vmul.f32 %v1185_v60, %v1179_v14  ;;  %v1690_v60 = vld [vmem:[%s4019_s8 + $0x20] sm:$0xff]  ;;  %v1699_v14 = vld [vmem:[%s4019_s8 + $0x68] sm:$0xff] }
 0x4ff   : > { %v1193_v27 = vadd.f32 1.0, %v1189_v22 }
 0x501   : > { %v2774_v28 = vpack.c.bf16 %v1193_v27, %v1192_v23 }
 0x503   : > { %2775 = vmatprep.subr.bf16.mxu0 %v2774_v28 }
 0x504   : > { %2777 = vmatpush3.bf16.msra.mxu0 %v2774_v28 }
 0x505   : > { %2779 = vmatprep.subr.bf16.mxu0 %v3095_v18  ;;  %v1199_v18 = vld [vmem:[%s4020_s9 + $0x28] sm:$0xff] }
 0x507   : > { %2659 = vmatmul.mubr.msk.f32.vlgmr.msra.gmra.mrb[16].mxu0 %vm507_vm0, %v1195_v29  ;;  %v1702_v29 = vld [vmem:[%s4019_s8 + $0x80] sm:$0xff] }
 0x508   : > { %2661 = vmatprep.mubr.msk.f32.mxu0 %vm507_vm0, %v1196_v32  ;;  %2781 = vmatpush1.bf16.msra.mxu0 %v3097_v19  ;;  %v1200_v19 = vld [vmem:[%s4020_s9 + $0x30] sm:$0xff] }
 0x509   : > { %2514 = vmatprep.subr.msk.mxu0 %vm610_vm1, %v3099_v20  ;;  %v1201_v20 = vld [vmem:[%s4020_s9 + $0x38] sm:$0xff] }
 0x50b   : > { %2662 = vmatmul.mubr.msk.f32.gmra.mrb[18].mxu0 %vm507_vm0, %v1197_v35 }
 0x50c   : > { %2664 = vmatprep.mubr.msk.f32.mxu0 %vm507_vm0, %v1198_v38  ;;  %2515 = vmatpush1.msk.msra.mxu0 %vm610_vm1, %v3120_v26  ;;  %v1203_v26 = vld [vmem:[%s4020_s9 + $0x48] sm:$0xff] }
 0x50d   : > { %v1703_v38 = vld [vmem:[%s4019_s8 + $0x88] sm:$0xff] }
 0x50f   : > { %2665 = vmatmul.mubr.msk.f32.gmra.mrb[20].mxu0 %vm507_vm0, %v1199_v18 }
 0x510   : > { %2667 = vmatprep.mubr.msk.f32.mxu0 %vm507_vm0, %v1200_v19 }
 0x513   : > { %2668 = vmatmul.mubr.msk.f32.gmra.mrb[22].mxu0 %vm507_vm0, %v1201_v20  ;;  %v1704_v20 = vld [vmem:[%s4019_s8 + $0x90] sm:$0xff] }
 0x514   : > { %2670 = vmatprep.mubr.msk.f32.mxu0 %vm507_vm0, %v1202_v41 }
 0x517   : > { %2671 = vmatmul.mubr.msk.f32.gmra.mrb[24].mxu0 %vm507_vm0, %v1203_v26 }
 0x518   : > { %2673 = vmatprep.mubr.msk.f32.mxu0 %vm507_vm0, %v1204_v44  ;;  %v1705_v44 = vld [vmem:[%s4019_s8 + $0x98] sm:$0xff] }
 0x51b   : > { %2674 = vmatmul.mubr.msk.f32.gmra.mrb[26].mxu0 %vm507_vm0, %v1205_v45 }
 0x51c   : > { %2676 = vmatprep.mubr.msk.f32.mxu0 %vm507_vm0, %v1206_v46 }
 0x51f   : > { %2677 = vmatmul.mubr.msk.f32.gmra.mrb[28].mxu0 %vm507_vm0, %v1207_v47 }
 0x520   : > { %2679 = vmatprep.mubr.msk.f32.mxu0 %vm507_vm0, %v1208_v48 }
 0x523   : > { %2680 = vmatmul.mubr.msk.f32.gmra.mrb[30].mxu0 %vm507_vm0, %v1209_v49 }
 0x524   : > { %2682 = vmatprep.mubr.msk.f32.mxu0 %vm507_vm0, %v1210_v50 }
 0x527   : > { %2683 = vmatmul.mubr.msk.f32.gmra.mrb[32].mxu0 %vm507_vm0, %v1211_v51 }
 0x528   : > { %2685 = vmatprep.mubr.msk.f32.mxu0 %vm507_vm0, %v1212_v52 }
 0x52b   : > { %2686 = vmatmul.mubr.msk.f32.gmra.mrb[34].mxu0 %vm507_vm0, %v1213_v53 }
 0x52c   : > { %1830 = vmatprep.mubr.f32.mxu0 %v2918_v2 }
 0x52f   : > { %2516 = vmatmul.mubr.msk.f32.vlgmr.msra.gmra.mrb[36].mxu0 %vm606_vm2, %v1686_v54 }
 0x530   : > { %1836 = vmatprep.mubr.f32.mxu0 %v2918_v2 }
 0x533   : > { %2517 = vmatmul.mubr.msk.f32.gmra.mrb[38].mxu0 %vm606_vm2, %v1687_v55 }
 0x534   : > { %1842 = vmatprep.mubr.f32.mxu0 %v2918_v2 }
 0x537   : > { %2518 = vmatmul.mubr.msk.f32.gmra.mrb[40].mxu0 %vm606_vm2, %v1688_v56 }
 0x538   : > { %1848 = vmatprep.mubr.f32.mxu0 %v2918_v2 }
 0x53b   : > { %2519 = vmatmul.mubr.msk.f32.gmra.mrb[42].mxu0 %vm606_vm2, %v1689_v59 }
 0x53c   : > { %1854 = vmatprep.mubr.f32.mxu0 %v2918_v2 }
 0x53f   : > { %2520 = vmatmul.mubr.msk.f32.gmra.mrb[44].mxu0 %vm606_vm2, %v1690_v60 }
 0x540   : > { %1860 = vmatprep.mubr.f32.mxu0 %v2918_v2 }
 0x543   : > { %2521 = vmatmul.mubr.msk.f32.gmra.mrb[46].mxu0 %vm606_vm2, %v1691_v57 }
 0x544   : > { %1866 = vmatprep.mubr.f32.mxu0 %v2918_v2 }
 0x547   : > { %2522 = vmatmul.mubr.msk.f32.gmra.mrb[48].mxu0 %vm606_vm2, %v1692_v61 }
 0x548   : > { %1872 = vmatprep.mubr.f32.mxu0 %v2918_v2 }
 0x54b   : > { %2523 = vmatmul.mubr.msk.f32.gmra.mrb[50].mxu0 %vm606_vm2, %v1693_v58 }
 0x54c   : > { %1878 = vmatprep.mubr.f32.mxu0 %v2918_v2 }
 0x54f   : > { %2524 = vmatmul.mubr.msk.f32.gmra.mrb[52].mxu0 %vm606_vm2, %v1694_v62 }
 0x550   : > { %1884 = vmatprep.mubr.f32.mxu0 %v2918_v2 }
 0x553   : > { %2525 = vmatmul.mubr.msk.f32.gmra.mrb[54].mxu0 %vm606_vm2, %v1695_v63 }
 0x554   : > { %1890 = vmatprep.mubr.f32.mxu0 %v2918_v2 }
 0x557   : > { %2526 = vmatmul.mubr.msk.f32.gmra.mrb[56].mxu0 %vm606_vm2, %v1696_v0 }
 0x558   : > { %1896 = vmatprep.mubr.f32.mxu0 %v2918_v2 }
 0x55b   : > { %2527 = vmatmul.mubr.msk.f32.gmra.mrb[58].mxu0 %vm606_vm2, %v1697_v1 }
 0x55c   : > { %1902 = vmatprep.mubr.f32.mxu0 %v2918_v2 }
 0x55f   : > { %2528 = vmatmul.mubr.msk.f32.gmra.mrb[60].mxu0 %vm606_vm2, %v1698_v11 }
 0x560   : > { %1908 = vmatprep.mubr.f32.mxu0 %v2918_v2 }
 0x563   : > { %2529 = vmatmul.mubr.msk.f32.gmra.mrb[62].mxu0 %vm606_vm2, %v1699_v14 }
 0x564   : > { %1914 = vmatprep.mubr.f32.mxu0 %v2918_v2 }
 0x5da   : > { %v2660_v12 = vpop.f32.mrb[16].mxu0 }
 0x5db   : > { %v1340_v13 = vpop.f32.mrb[17].mxu0 }
 0x5dc   : > { %2494 = vmatmul.mubr.msk.f32.vlgmr.msra.gmra.mrb[22].mxu1 %vm1135_vm4, %v1340_v13 }
 0x5dd   : > { %1571 = vmatprep.mubr.f32.mxu1 %v2918_v2  ;;  %2785 = vmatpush1.bf16.msra.mxu1 %v3228_v6  ;;  %v1700_v6 = vld [vmem:[%s4019_s8 + $0x70] sm:$0xff] }
 0x5de   : > { %v2663_v21 = vpop.f32.mrb[18].mxu0  ;;  %2787 = vmatprep.subr.bf16.mxu1 %v3230_v8  ;;  %2530 = vmatmul.mubr.msk.f32.gmra.mrb[64].mxu0 %vm606_vm2, %v1700_v6  ;;  %v1701_v8 = vld [vmem:[%s4019_s8 + $0x78] sm:$0xff] }
 0x5df   : > { %v1350_v22 = vpop.f32.mrb[19].mxu0  ;;  %1920 = vmatprep.mubr.f32.mxu0 %v2918_v2 }
 0x5e0   : > { %2495 = vmatmul.mubr.msk.f32.gmra.mrb[24].mxu1 %vm1135_vm4, %v2660_v12 }
 0x5e1   : > { %1577 = vmatprep.mubr.f32.mxu1 %v2918_v2  ;;  %2789 = vmatpush1.bf16.msra.mxu1 %v3240_v15 }
 0x5e2   : > { %v2666_v23 = vpop.f32.mrb[20].mxu0  ;;  %2531 = vmatmul.mubr.msk.f32.gmra.mrb[66].mxu0 %vm606_vm2, %v1701_v8 }
 0x5e3   : > { %v1360_v27 = vpop.f32.mrb[21].mxu0  ;;  %1926 = vmatprep.mubr.f32.mxu0 %v2918_v2 }
 0x5e4   : > { %2496 = vmatmul.mubr.msk.f32.gmra.mrb[26].mxu1 %vm1135_vm4, %v1350_v22 }
 0x5e5   : > { %1583 = vmatprep.mubr.f32.mxu1 %v2918_v2 }
 0x5e6   : > { %v2669_v28 = vpop.f32.mrb[22].mxu0  ;;  %2532 = vmatmul.mubr.msk.f32.gmra.mrb[68].mxu0 %vm606_vm2, %v1702_v29 }
 0x5e7   : > { %v1370_v15 = vpop.f32.mrb[23].mxu0  ;;  %1932 = vmatprep.mubr.f32.mxu0 %v2918_v2 }
 0x5e8   : > { %2497 = vmatmul.mubr.msk.f32.gmra.mrb[28].mxu1 %vm1135_vm4, %v2663_v21 }
 0x5e9   : > { %1589 = vmatprep.mubr.f32.mxu1 %v2918_v2 }
 0x5ea   : > { %v2672_v32 = vpop.f32.mrb[24].mxu0  ;;  %2533 = vmatmul.mubr.msk.f32.gmra.mrb[70].mxu0 %vm606_vm2, %v1703_v38 }
 0x5eb   : > { %v1380_v35 = vpop.f32.mrb[25].mxu0  ;;  %1938 = vmatprep.mubr.f32.mxu0 %v2918_v2 }
 0x5ec   : > { %2498 = vmatmul.mubr.msk.f32.gmra.mrb[30].mxu1 %vm1135_vm4, %v1360_v27 }
 0x5ed   : > { %1595 = vmatprep.mubr.f32.mxu1 %v2918_v2 }
 0x5ee   : > { %v2675_v18 = vpop.f32.mrb[26].mxu0  ;;  %2534 = vmatmul.mubr.msk.f32.gmra.mrb[72].mxu0 %vm606_vm2, %v1704_v20 }
 0x5ef   : > { %v1390_v19 = vpop.f32.mrb[27].mxu0  ;;  %1944 = vmatprep.mubr.f32.mxu0 %v2918_v2 }
 0x5f0   : > { %2499 = vmatmul.mubr.msk.f32.gmra.mrb[32].mxu1 %vm1135_vm4, %v2666_v23 }
 0x5f1   : > { %1601 = vmatprep.mubr.f32.mxu1 %v2918_v2 }
 0x5f2   : > { %v2678_v41 = vpop.f32.mrb[28].mxu0  ;;  %2535 = vmatmul.mubr.msk.f32.gmra.mrb[74].mxu0 %vm606_vm2, %v1705_v44 }
 0x5f3   : > { %v1400_v26 = vpop.f32.mrb[29].mxu0 }
 0x5f4   : > { %2500 = vmatmul.mubr.msk.f32.gmra.mrb[34].mxu1 %vm1135_vm4, %v1370_v15 }
 0x5f5   : > { %1607 = vmatprep.mubr.f32.mxu1 %v2918_v2 }
 0x5f6   : > { %v2681_v45 = vpop.f32.mrb[30].mxu0 }
 0x5f7   : > { %v1410_v46 = vpop.f32.mrb[31].mxu0 }
 0x5f8   : > { %2501 = vmatmul.mubr.msk.f32.gmra.mrb[36].mxu1 %vm1135_vm4, %v2669_v28 }
 0x5f9   : > { %1613 = vmatprep.mubr.f32.mxu1 %v2918_v2 }
 0x5fa   : > { %v2684_v47 = vpop.f32.mrb[32].mxu0 }
 0x5fb   : > { %v1420_v48 = vpop.f32.mrb[33].mxu0 }
 0x5fc   : > { %2502 = vmatmul.mubr.msk.f32.gmra.mrb[38].mxu1 %vm1135_vm4, %v1380_v35 }
 0x5fd   : > { %1619 = vmatprep.mubr.f32.mxu1 %v2918_v2 }
 0x5fe   : > { %v2687_v49 = vpop.f32.mrb[34].mxu0 }
 0x5ff   : > { %v1430_v50 = vpop.f32.mrb[35].mxu0 }
 0x600   : > { %2503 = vmatmul.mubr.msk.f32.gmra.mrb[40].mxu1 %vm1135_vm4, %v2672_v32 }
 0x601   : > { %1625 = vmatprep.mubr.f32.mxu1 %v2918_v2 }
 0x604   : > { %2504 = vmatmul.mubr.msk.f32.gmra.mrb[42].mxu1 %vm1135_vm4, %v1390_v19 }
 0x605   : > { %1631 = vmatprep.mubr.f32.mxu1 %v2918_v2 }
 0x608   : > { %2505 = vmatmul.mubr.msk.f32.gmra.mrb[44].mxu1 %vm1135_vm4, %v2675_v18 }
 0x609   : > { %1637 = vmatprep.mubr.f32.mxu1 %v2918_v2 }
 0x60c   : > { %2506 = vmatmul.mubr.msk.f32.gmra.mrb[46].mxu1 %vm1135_vm4, %v1400_v26 }
 0x60d   : > { %1643 = vmatprep.mubr.f32.mxu1 %v2918_v2 }
 0x610   : > { %2507 = vmatmul.mubr.msk.f32.gmra.mrb[48].mxu1 %vm1135_vm4, %v2678_v41 }
 0x611   : > { %1649 = vmatprep.mubr.f32.mxu1 %v2918_v2 }
 0x614   : > { %2508 = vmatmul.mubr.msk.f32.gmra.mrb[50].mxu1 %vm1135_vm4, %v1410_v46 }
 0x615   : > { %1655 = vmatprep.mubr.f32.mxu1 %v2918_v2 }
 0x618   : > { %2509 = vmatmul.mubr.msk.f32.gmra.mrb[52].mxu1 %vm1135_vm4, %v2681_v45 }
 0x619   : > { %1661 = vmatprep.mubr.f32.mxu1 %v2918_v2 }
 0x61c   : > { %2510 = vmatmul.mubr.msk.f32.gmra.mrb[54].mxu1 %vm1135_vm4, %v1420_v48 }
 0x61d   : > { %1667 = vmatprep.mubr.f32.mxu1 %v2918_v2 }
 0x620   : > { %2511 = vmatmul.mubr.msk.f32.gmra.mrb[56].mxu1 %vm1135_vm4, %v2684_v47 }
 0x621   : > { %1673 = vmatprep.mubr.f32.mxu1 %v2918_v2 }
 0x624   : > { %2512 = vmatmul.mubr.msk.f32.gmra.mrb[58].mxu1 %vm1135_vm4, %v1430_v50 }
 0x625   : > { %1679 = vmatprep.mubr.f32.mxu1 %v2918_v2 }
 0x628   : > { %2513 = vmatmul.mubr.msk.f32.gmra.mrb[60].mxu1 %vm1135_vm4, %v2687_v49 }
 0x629   : > { %2083 = vmatprep.mubr.f32.mxu1 %v2918_v2 }
 0x62c   : > { %2536 = vmatmul.mubr.msk.f32.vlgmr.msra.gmra.mrb[62].mxu1 %vm507_vm0, %v3061_v3  ;;  %v3680_v3 = vpop.f32.mrb[36].mxu0 }
 0x62d   : > { %2089 = vmatprep.mubr.f32.mxu1 %v2918_v2 }
 0x630   : > { %2537 = vmatmul.mubr.msk.f32.gmra.mrb[64].mxu1 %vm507_vm0, %v3064_v4  ;;  %v3682_v4 = vpop.f32.mrb[37].mxu0 }
 0x631   : > { %2095 = vmatprep.mubr.f32.mxu1 %v2918_v2 }
 0x634   : > { %2538 = vmatmul.mubr.msk.f32.gmra.mrb[66].mxu1 %vm507_vm0, %v3067_v5  ;;  %v3684_v5 = vpop.f32.mrb[38].mxu0 }
 0x635   : > { %2101 = vmatprep.mubr.f32.mxu1 %v2918_v2 }
 0x638   : > { %2539 = vmatmul.mubr.msk.f32.gmra.mrb[68].mxu1 %vm507_vm0, %v3072_v7  ;;  %v3686_v7 = vpop.f32.mrb[39].mxu0 }
 0x639   : > { %2107 = vmatprep.mubr.f32.mxu1 %v2918_v2 }
 0x63c   : > { %2540 = vmatmul.mubr.msk.f32.gmra.mrb[70].mxu1 %vm507_vm0, %v3081_v9  ;;  %v3688_v9 = vpop.f32.mrb[40].mxu0 }
 0x63d   : > { %2113 = vmatprep.mubr.f32.mxu1 %v2918_v2 }
 0x640   : > { %2541 = vmatmul.mubr.msk.f32.gmra.mrb[72].mxu1 %vm507_vm0, %v3084_v10  ;;  %v3690_v10 = vpop.f32.mrb[41].mxu0 }
 0x641   : > { %2119 = vmatprep.mubr.f32.mxu1 %v2918_v2 }
 0x644   : > { %2542 = vmatmul.mubr.msk.f32.gmra.mrb[74].mxu1 %vm507_vm0, %v3090_v16  ;;  %v3692_v16 = vpop.f32.mrb[42].mxu0 }
 0x645   : > { %2125 = vmatprep.mubr.f32.mxu1 %v2918_v2 }
 0x648   : > { %2543 = vmatmul.mubr.msk.f32.gmra.mrb[76].mxu1 %vm507_vm0, %v3093_v17  ;;  %v3694_v17 = vpop.f32.mrb[43].mxu0 }
 0x649   : > { %2131 = vmatprep.mubr.f32.mxu1 %v2918_v2 }
 0x64c   : > { %2544 = vmatmul.mubr.msk.f32.gmra.mrb[78].mxu1 %vm507_vm0, %v3113_v24 }
 0x64d   : > { %2137 = vmatprep.mubr.f32.mxu1 %v2918_v2 }
 0x650   : > { %2545 = vmatmul.mubr.msk.f32.gmra.mrb[80].mxu1 %vm507_vm0, %v3116_v25 }
 0x651   : > { %2143 = vmatprep.mubr.f32.mxu1 %v2918_v2 }
 0x654   : > { %2546 = vmatmul.mubr.msk.f32.gmra.mrb[82].mxu1 %vm507_vm0, %v3131_v30 }
 0x655   : > { %2149 = vmatprep.mubr.f32.mxu1 %v2918_v2 }
 0x658   : > { %2547 = vmatmul.mubr.msk.f32.gmra.mrb[84].mxu1 %vm507_vm0, %v3134_v31 }
 0x659   : > { %2155 = vmatprep.mubr.f32.mxu1 %v2918_v2 }
 0x65c   : > { %2548 = vmatmul.mubr.msk.f32.gmra.mrb[86].mxu1 %vm507_vm0, %v3141_v33 }
 0x65d   : > { %2161 = vmatprep.mubr.f32.mxu1 %v2918_v2 }
 0x660   : > { %2549 = vmatmul.mubr.msk.f32.gmra.mrb[88].mxu1 %vm507_vm0, %v3144_v34 }
 0x661   : > { %2167 = vmatprep.mubr.f32.mxu1 %v2918_v2 }
 0x664   : > { %2550 = vmatmul.mubr.msk.f32.gmra.mrb[90].mxu1 %vm507_vm0, %v3150_v36 }
 0x665   : > { %2173 = vmatprep.mubr.f32.mxu1 %v2918_v2 }
 0x668   : > { %2551 = vmatmul.mubr.msk.f32.gmra.mrb[92].mxu1 %vm507_vm0, %v3153_v37 }
 0x669   : > { %2179 = vmatprep.mubr.f32.mxu1 %v2918_v2 }
 0x66c   : > { %2552 = vmatmul.mubr.msk.f32.gmra.mrb[94].mxu1 %vm507_vm0, %v3159_v39 }
 0x66d   : > { %2185 = vmatprep.mubr.f32.mxu1 %v2918_v2 }
 0x670   : > { %2553 = vmatmul.mubr.msk.f32.gmra.mrb[96].mxu1 %vm507_vm0, %v3162_v40 }
 0x671   : > { %2191 = vmatprep.mubr.f32.mxu1 %v2918_v2 }
 0x674   : > { %2554 = vmatmul.mubr.msk.f32.gmra.mrb[98].mxu1 %vm507_vm0, %v3168_v42 }
 0x675   : > { %2197 = vmatprep.mubr.f32.mxu1 %v2918_v2  ;;  %v3696_v2 = vpop.f32.mrb[44].mxu0 }
 0x676   : > { %v3698_v24 = vpop.f32.mrb[45].mxu0 }
 0x677   : > { %v3700_v25 = vpop.f32.mrb[46].mxu0 }
 0x678   : > { %2555 = vmatmul.mubr.msk.f32.gmra.mrb[100].mxu1 %vm507_vm0, %v3171_v43  ;;  %v3702_v30 = vpop.f32.mrb[47].mxu0 }
 0x679   : > { %v3704_v31 = vpop.f32.mrb[48].mxu0 }
 0x67a   : > { %v3706_v33 = vpop.f32.mrb[49].mxu0 }
 0x67b   : > { %v3708_v34 = vpop.f32.mrb[50].mxu0 }
 0x67c   : > { %v3710_v36 = vpop.f32.mrb[51].mxu0 }
 0x67d   : > { %v3712_v37 = vpop.f32.mrb[52].mxu0 }
 0x67e   : > { %v3714_v39 = vpop.f32.mrb[53].mxu0 }
 0x67f   : > { %v3716_v40 = vpop.f32.mrb[54].mxu0 }
 0x680   : > { %v3718_v42 = vpop.f32.mrb[55].mxu0 }
 0x681   : > { %v3720_v43 = vpop.f32.mrb[56].mxu0 }
 0x682   : > { %v3722_v51 = vpop.f32.mrb[57].mxu0 }
 0x683   : > { %v3724_v52 = vpop.f32.mrb[58].mxu0 }
 0x684   : > { %v3726_v53 = vpop.f32.mrb[59].mxu0 }
 0x685   : > { %v3728_v55 = vpop.f32.mrb[60].mxu0 }
 0x686   : > { %v3730_v59 = vpop.f32.mrb[61].mxu0 }
 0x687   : > { %v3734_v57 = vpop.f32.mrb[62].mxu0 }
 0x688   : > { %v3738_v58 = vpop.f32.mrb[63].mxu0 }
 0x689   : > { %4033 = vst [vmem:[#allocation6_spill] sm:$0xff] %v3738_v58 }
 0x6af   : > { %v1567_v54 = vpop.f32.mrb[22].mxu1 }
 0x6b0   : > { %v1569_v56 = vpop.f32.mrb[23].mxu1 }
 0x6b1   : > { %v3742_v63 = vpop.f32.mrb[64].mxu0 }
 0x6b2   : > { %4034 = vst [vmem:[#allocation7_spill] sm:$0xff] %v3742_v63  ;;  %v3746_v1 = vpop.f32.mrb[65].mxu0 }
 0x6b3   : > { %v3732_v60 = vpop.f32.mrb[24].mxu1  ;;  %4035 = vst [vmem:[#allocation8_spill] sm:$0xff] %v3746_v1 }
 0x6b4   : > { %v3736_v61 = vpop.f32.mrb[25].mxu1 }
 0x6b5   : > { %v3750_v12 = vpop.f32.mrb[66].mxu0 }
 0x6b6   : > { %4036 = vst [vmem:[#allocation9_spill] sm:$0xff] %v3750_v12  ;;  %v3754_v14 = vpop.f32.mrb[67].mxu0 }
 0x6b7   : > { %v3740_v62 = vpop.f32.mrb[26].mxu1  ;;  %4037 = vst [vmem:[#allocation10_spill] sm:$0xff] %v3754_v14 }
 0x6b8   : > { %v3744_v0 = vpop.f32.mrb[27].mxu1 }
 0x6b9   : > { %v3758_v22 = vpop.f32.mrb[68].mxu0 }
 0x6ba   : > { %4038 = vst [vmem:[#allocation11_spill] sm:$0xff] %v3758_v22  ;;  %v3762_v23 = vpop.f32.mrb[69].mxu0 }
 0x6bb   : > { %v3748_v11 = vpop.f32.mrb[28].mxu1  ;;  %4039 = vst [vmem:[#allocation12_spill] sm:$0xff] %v3762_v23 }
 0x6bc   : > { %v3752_v13 = vpop.f32.mrb[29].mxu1 }
 0x6bd   : > { %v3766_v8 = vpop.f32.mrb[70].mxu0 }
 0x6be   : > { %4040 = vst [vmem:[#allocation13_spill] sm:$0xff] %v3766_v8  ;;  %v3770_v15 = vpop.f32.mrb[71].mxu0 }
 0x6bf   : > { %v3756_v21 = vpop.f32.mrb[30].mxu1  ;;  %4041 = vst [vmem:[#allocation14_spill] sm:$0xff] %v3770_v15 }
 0x6c0   : > { %v3760_v6 = vpop.f32.mrb[31].mxu1 }
 0x6c1   : > { %v3774_v32 = vpop.f32.mrb[72].mxu0 }
 0x6c2   : > { %4042 = vst [vmem:[#allocation15_spill] sm:$0xff] %v3774_v32  ;;  %v3778_v38 = vpop.f32.mrb[73].mxu0 }
 0x6c3   : > { %v3764_v27 = vpop.f32.mrb[32].mxu1  ;;  %4043 = vst [vmem:[#allocation16_spill] sm:$0xff] %v3778_v38 }
 0x6c4   : > { %v3768_v28 = vpop.f32.mrb[33].mxu1 }
 0x6c5   : > { %v3782_v19 = vpop.f32.mrb[74].mxu0 }
 0x6c6   : > { %4044 = vst [vmem:[#allocation17_spill] sm:$0xff] %v3782_v19  ;;  %v3786_v41 = vpop.f32.mrb[75].mxu0 }
 0x6c7   : > { %v3772_v29 = vpop.f32.mrb[34].mxu1  ;;  %4045 = vst [vmem:[#allocation18_spill] sm:$0xff] %v3786_v41 }
 0x6c8   : > { %v3776_v35 = vpop.f32.mrb[35].mxu1 }
 0x6cb   : > { %v3780_v18 = vpop.f32.mrb[36].mxu1 }
 0x6cc   : > { %v3784_v20 = vpop.f32.mrb[37].mxu1 }
 0x6cf   : > { %v3788_v26 = vpop.f32.mrb[38].mxu1 }
 0x6d0   : > { %v3790_v44 = vpop.f32.mrb[39].mxu1 }
 0x6d3   : > { %v3792_v45 = vpop.f32.mrb[40].mxu1 }
 0x6d4   : > { %v3794_v46 = vpop.f32.mrb[41].mxu1 }
 0x6d7   : > { %v3796_v47 = vpop.f32.mrb[42].mxu1 }
 0x6d8   : > { %v3798_v48 = vpop.f32.mrb[43].mxu1 }
 0x6db   : > { %v3800_v49 = vpop.f32.mrb[44].mxu1 }
 0x6dc   : > { %v3802_v50 = vpop.f32.mrb[45].mxu1 }
 0x6df   : > { %v3804_v19 = vpop.f32.mrb[46].mxu1 }
 0x6e0   : > { %v3806_v41 = vpop.f32.mrb[47].mxu1 }
 0x6e3   : > { %v3808_v38 = vpop.f32.mrb[48].mxu1 }
 0x6e4   : > { %4046 = vst [vmem:[#allocation19_spill] sm:$0xff] %v3808_v38  ;;  %v3810_v32 = vpop.f32.mrb[49].mxu1 }
 0x6e5   : > { %4047 = vst [vmem:[#allocation20_spill] sm:$0xff] %v3810_v32 }
 0x6e7   : > { %v3812_v15 = vpop.f32.mrb[50].mxu1 }
 0x6e8   : > { %4048 = vst [vmem:[#allocation21_spill] sm:$0xff] %v3812_v15  ;;  %v3814_v8 = vpop.f32.mrb[51].mxu1 }
 0x6e9   : > { %4049 = vst [vmem:[#allocation22_spill] sm:$0xff] %v3814_v8 }
 0x6eb   : > { %v3816_v23 = vpop.f32.mrb[52].mxu1 }
 0x6ec   : > { %4050 = vst [vmem:[#allocation23_spill] sm:$0xff] %v3816_v23  ;;  %v3818_v22 = vpop.f32.mrb[53].mxu1 }
 0x6ed   : > { %4051 = vst [vmem:[#allocation24_spill] sm:$0xff] %v3818_v22 }
 0x6ef   : > { %v3820_v14 = vpop.f32.mrb[54].mxu1 }
 0x6f0   : > { %4052 = vst [vmem:[#allocation25_spill] sm:$0xff] %v3820_v14  ;;  %v3822_v12 = vpop.f32.mrb[55].mxu1 }
 0x6f1   : > { %4053 = vst [vmem:[#allocation26_spill] sm:$0xff] %v3822_v12 }
 0x6f3   : > { %v3824_v1 = vpop.f32.mrb[56].mxu1 }
 0x6f4   : > { %4054 = vst [vmem:[#allocation27_spill] sm:$0xff] %v3824_v1  ;;  %v3826_v63 = vpop.f32.mrb[57].mxu1 }
 0x6f5   : > { %4055 = vst [vmem:[#allocation28_spill] sm:$0xff] %v3826_v63 }
 0x6f7   : > { %v3828_v58 = vpop.f32.mrb[58].mxu1 }
 0x6f8   : > { %v3830_v38 = vpop.f32.mrb[59].mxu1 }
 0x6fb   : > { %v3833_v15 = vpop.f32.mrb[60].mxu1 }
 0x6fc   : > { %4056 = vst [vmem:[#allocation29_spill] sm:$0xff] %v3833_v15  ;;  %v3835_v8 = vpop.f32.mrb[61].mxu1 }
 0x6fd   : > { %4057 = vst [vmem:[#allocation30_spill] sm:$0xff] %v3835_v8 }
 0x6ff   : > { %v2085_v22 = vpop.f32.mrb[62].mxu1 }
 0x700   : > { %v2204_v14 = vmul.f32 %v2085_v22, %v3680_v3  ;;  %v2087_v23 = vpop.f32.mrb[63].mxu1 }
 0x701   : > { %v2205_v12 = vmul.f32 %v2087_v23, %v3682_v4 }
 0x702   : > { %v2244_v1 = vmul.f32 %v2204_v14, %v1567_v54 }
 0x703   : > { %v2245_v32 = vmul.f32 %v2205_v12, %v1569_v56  ;;  %v2091_v63 = vpop.f32.mrb[64].mxu1 }
 0x704   : > { %2284 = vst [vmem:[%s3841_s17] sm:$0xff] %v2244_v1  ;;  %v2206_v8 = vmul.f32 %v2091_v63, %v3684_v5  ;;  %v2093_v15 = vpop.f32.mrb[65].mxu1 }
 0x705   : > { %2285 = vst [vmem:[%s3841_s17 + $0x8] sm:$0xff] %v2245_v32  ;;  %v2207_v3 = vmul.f32 %v2093_v15, %v3686_v7 }
 0x706   : > { %v2246_v4 = vmul.f32 %v2206_v8, %v3732_v60 }
 0x707   : > { %v2247_v54 = vmul.f32 %v2207_v3, %v3736_v61  ;;  %v2097_v56 = vpop.f32.mrb[66].mxu1 }
 0x708   : > { %2286 = vst [vmem:[%s3841_s17 + $0x10] sm:$0xff] %v2246_v4  ;;  %v2208_v12 = vmul.f32 %v2097_v56, %v3688_v9  ;;  %v2099_v14 = vpop.f32.mrb[67].mxu1 }
 0x709   : > { %2287 = vst [vmem:[%s3841_s17 + $0x18] sm:$0xff] %v2247_v54  ;;  %v2209_v1 = vmul.f32 %v2099_v14, %v3690_v10 }
 0x70a   : > { %v2248_v5 = vmul.f32 %v2208_v12, %v3740_v62 }
 0x70b   : > { %v2249_v63 = vmul.f32 %v2209_v1, %v3744_v0  ;;  %v2103_v22 = vpop.f32.mrb[68].mxu1 }
 0x70c   : > { %2288 = vst [vmem:[%s3841_s17 + $0x20] sm:$0xff] %v2248_v5  ;;  %v2210_v7 = vmul.f32 %v2103_v22, %v3692_v16  ;;  %v2105_v60 = vpop.f32.mrb[69].mxu1 }
 0x70d   : > { %2289 = vst [vmem:[%s3841_s17 + $0x28] sm:$0xff] %v2249_v63  ;;  %v2211_v61 = vmul.f32 %v2105_v60, %v3694_v17 }
 0x70e   : > { %v2250_v9 = vmul.f32 %v2210_v7, %v3748_v11 }
 0x70f   : > { %v2251_v23 = vmul.f32 %v2211_v61, %v3752_v13  ;;  %v2109_v8 = vpop.f32.mrb[70].mxu1 }
 0x710   : > { %2290 = vst [vmem:[%s3841_s17 + $0x30] sm:$0xff] %v2250_v9  ;;  %v2212_v10 = vmul.f32 %v2109_v8, %v3696_v2  ;;  %v2111_v62 = vpop.f32.mrb[71].mxu1 }
 0x711   : > { %2291 = vst [vmem:[%s3841_s17 + $0x38] sm:$0xff] %v2251_v23  ;;  %v2213_v0 = vmul.f32 %v2111_v62, %v3698_v24 }
 0x712   : > { %v2252_v16 = vmul.f32 %v2212_v10, %v3756_v21 }
 0x713   : > { %v2253_v15 = vmul.f32 %v2213_v0, %v3760_v6  ;;  %v2115_v32 = vpop.f32.mrb[72].mxu1  ;;  %v4060_v0 = vld [vmem:[#allocation20_spill] sm:$0xff] }
 0x714   : > { %2292 = vst [vmem:[%s3841_s17 + $0x40] sm:$0xff] %v2252_v16  ;;  %v2214_v17 = vmul.f32 %v2115_v32, %v3700_v25  ;;  %v2117_v11 = vpop.f32.mrb[73].mxu1  ;;  %v4062_v32 = vld [vmem:[#allocation8_spill] sm:$0xff] }
 0x715   : > { %2293 = vst [vmem:[%s3841_s17 + $0x48] sm:$0xff] %v2253_v15  ;;  %v2215_v13 = vmul.f32 %v2117_v11, %v3702_v30 }
 0x716   : > { %v2254_v2 = vmul.f32 %v2214_v17, %v3764_v27 }
 0x717   : > { %v2255_v3 = vmul.f32 %v2215_v13, %v3768_v28  ;;  %v2121_v4 = vpop.f32.mrb[74].mxu1  ;;  %v4064_v13 = vld [vmem:[#allocation22_spill] sm:$0xff] }
 0x718   : > { %2294 = vst [vmem:[%s3841_s17 + $0x50] sm:$0xff] %v2254_v2  ;;  %v2216_v24 = vmul.f32 %v2121_v4, %v3704_v31  ;;  %v2123_v21 = vpop.f32.mrb[75].mxu1  ;;  %v4065_v4 = vld [vmem:[#allocation9_spill] sm:$0xff] }
 0x719   : > { %2295 = vst [vmem:[%s3841_s17 + $0x58] sm:$0xff] %v2255_v3  ;;  %v2217_v6 = vmul.f32 %v2123_v21, %v3706_v33 }
 0x71a   : > { %v2256_v25 = vmul.f32 %v2216_v24, %v3772_v29 }
 0x71b   : > { %v2257_v54 = vmul.f32 %v2217_v6, %v3776_v35  ;;  %v2127_v56 = vpop.f32.mrb[76].mxu1  ;;  %v4066_v6 = vld [vmem:[#allocation10_spill] sm:$0xff] }
 0x71c   : > { %2296 = vst [vmem:[%s3841_s17 + $0x60] sm:$0xff] %v2256_v25  ;;  %v2218_v30 = vmul.f32 %v2127_v56, %v3708_v34  ;;  %v2129_v27 = vpop.f32.mrb[77].mxu1 }
 0x71d   : > { %2297 = vst [vmem:[%s3841_s17 + $0x68] sm:$0xff] %v2257_v54  ;;  %v2219_v28 = vmul.f32 %v2129_v27, %v3710_v36  ;;  %v4067_v54 = vld [vmem:[#allocation23_spill] sm:$0xff] }
 0x71e   : > { %v2258_v31 = vmul.f32 %v2218_v30, %v3780_v18  ;;  %v4068_v30 = vld [vmem:[#allocation24_spill] sm:$0xff] }
 0x71f   : > { %v2259_v12 = vmul.f32 %v2219_v28, %v3784_v20  ;;  %v2133_v14 = vpop.f32.mrb[78].mxu1 }
 0x720   : > { %2298 = vst [vmem:[%s3841_s17 + $0x70] sm:$0xff] %v2258_v31  ;;  %v2220_v33 = vmul.f32 %v2133_v14, %v3712_v37  ;;  %v2135_v29 = vpop.f32.mrb[79].mxu1  ;;  %v4069_v31 = vld [vmem:[#allocation11_spill] sm:$0xff] }
 0x721   : > { %2299 = vst [vmem:[%s3841_s17 + $0x78] sm:$0xff] %v2259_v12  ;;  %v2221_v35 = vmul.f32 %v2135_v29, %v3714_v39 }
 0x722   : > { %v2260_v34 = vmul.f32 %v2220_v33, %v3788_v26  ;;  %v4070_v33 = vld [vmem:[#allocation12_spill] sm:$0xff] }
 0x723   : > { %v2261_v1 = vmul.f32 %v2221_v35, %v3790_v44  ;;  %v2139_v5 = vpop.f32.mrb[80].mxu1  ;;  %v4071_v35 = vld [vmem:[#allocation25_spill] sm:$0xff] }
 0x724   : > { %2300 = vst [vmem:[%s3841_s17 + $0x80] sm:$0xff] %v2260_v34  ;;  %v2222_v36 = vmul.f32 %v2139_v5, %v3716_v40  ;;  %v2141_v18 = vpop.f32.mrb[81].mxu1 }
 0x725   : > { %2301 = vst [vmem:[%s3841_s17 + $0x88] sm:$0xff] %v2261_v1  ;;  %v2223_v20 = vmul.f32 %v2141_v18, %v3718_v42  ;;  %v4072_v1 = vld [vmem:[#allocation26_spill] sm:$0xff]  ;;  %v4073_v18 = vld [vmem:[#allocation13_spill] sm:$0xff] }
 0x726   : > { %v2262_v37 = vmul.f32 %v2222_v36, %v3792_v45 }
 0x727   : > { %v2263_v63 = vmul.f32 %v2223_v20, %v3794_v46  ;;  %v2145_v22 = vpop.f32.mrb[82].mxu1 }
 0x728   : > { %2302 = vst [vmem:[%s3841_s17 + $0x90] sm:$0xff] %v2262_v37  ;;  %v2224_v39 = vmul.f32 %v2145_v22, %v3720_v43  ;;  %v2147_v26 = vpop.f32.mrb[83].mxu1 }
 0x729   : > { %2303 = vst [vmem:[%s3841_s17 + $0x98] sm:$0xff] %v2263_v63  ;;  %v2225_v44 = vmul.f32 %v2147_v26, %v3722_v51  ;;  %v4074_v63 = vld [vmem:[#allocation14_spill] sm:$0xff] }
 0x72a   : > { %v2264_v40 = vmul.f32 %v2224_v39, %v3796_v47  ;;  %v4075_v39 = vld [vmem:[#allocation27_spill] sm:$0xff] }
 0x72b   : > { %v2265_v7 = vmul.f32 %v2225_v44, %v3798_v48  ;;  %v2151_v60 = vpop.f32.mrb[84].mxu1  ;;  %v4076_v44 = vld [vmem:[#allocation28_spill] sm:$0xff] }
 0x72c   : > { %2304 = vst [vmem:[%s3841_s17 + $0xa0] sm:$0xff] %v2264_v40  ;;  %v2226_v42 = vmul.f32 %v2151_v60, %v3724_v52  ;;  %v2153_v45 = vpop.f32.mrb[85].mxu1  ;;  %v4077_v60 = vld [vmem:[#allocation15_spill] sm:$0xff] }
 0x72d   : > { %2305 = vst [vmem:[%s3841_s17 + $0xa8] sm:$0xff] %v2265_v7  ;;  %v2227_v46 = vmul.f32 %v2153_v45, %v3726_v53 }
 0x72e   : > { %v2266_v43 = vmul.f32 %v2226_v42, %v3800_v49 }
 0x72f   : > { %v2267_v61 = vmul.f32 %v2227_v46, %v3802_v50  ;;  %v2157_v9 = vpop.f32.mrb[86].mxu1  ;;  %v4058_v50 = vld [vmem:[#allocation6_spill] sm:$0xff]  ;;  %v4078_v46 = vld [vmem:[#allocation16_spill] sm:$0xff] }
 0x730   : > { %2306 = vst [vmem:[%s3841_s17 + $0xb0] sm:$0xff] %v2266_v43  ;;  %v2228_v51 = vmul.f32 %v2157_v9, %v3728_v55  ;;  %v2159_v47 = vpop.f32.mrb[87].mxu1  ;;  %v4059_v55 = vld [vmem:[#allocation19_spill] sm:$0xff] }
 0x731   : > { %2307 = vst [vmem:[%s3841_s17 + $0xb8] sm:$0xff] %v2267_v61  ;;  %v2229_v48 = vmul.f32 %v2159_v47, %v3730_v59  ;;  %v4061_v59 = vld [vmem:[#allocation7_spill] sm:$0xff]  ;;  %v4079_v47 = vld [vmem:[#allocation17_spill] sm:$0xff] }
 0x732   : > { %v2268_v52 = vmul.f32 %v2228_v51, %v3804_v19 }
 0x733   : > { %v2269_v23 = vmul.f32 %v2229_v48, %v3806_v41  ;;  %v2163_v8 = vpop.f32.mrb[88].mxu1 }
 0x734   : > { %2308 = vst [vmem:[%s3841_s17 + $0xc0] sm:$0xff] %v2268_v52  ;;  %v2230_v53 = vmul.f32 %v2163_v8, %v3734_v57  ;;  %v2165_v49 = vpop.f32.mrb[89].mxu1  ;;  %v4063_v57 = vld [vmem:[#allocation21_spill] sm:$0xff] }
 0x735   : > { %2309 = vst [vmem:[%s3841_s17 + $0xc8] sm:$0xff] %v2269_v23  ;;  %v2231_v10 = vmul.f32 %v2165_v49, %v4058_v50  ;;  %v4080_v23 = vld [vmem:[#allocation18_spill] sm:$0xff] }
 0x736   : > { %v2270_v62 = vmul.f32 %v2230_v53, %v4059_v55  ;;  %v4081_v53 = vld [vmem:[#allocation29_spill] sm:$0xff] }
 0x737   : > { %v2271_v16 = vmul.f32 %v2231_v10, %v4060_v0  ;;  %v2169_v15 = vpop.f32.mrb[90].mxu1 }
 0x738   : > { %2310 = vst [vmem:[%s3841_s17 + $0xd0] sm:$0xff] %v2270_v62  ;;  %v2232_v19 = vmul.f32 %v2169_v15, %v4061_v59  ;;  %v2171_v41 = vpop.f32.mrb[91].mxu1 }
 0x739   : > { %2311 = vst [vmem:[%s3841_s17 + $0xd8] sm:$0xff] %v2271_v16  ;;  %v2233_v17 = vmul.f32 %v2171_v41, %v4062_v32 }
 0x73a   : > { %v2272_v11 = vmul.f32 %v2232_v19, %v4063_v57 }
 0x73b   : > { %v2273_v2 = vmul.f32 %v2233_v17, %v4064_v13  ;;  %v2175_v3 = vpop.f32.mrb[92].mxu1 }
 0x73c   : > { %2312 = vst [vmem:[%s3841_s17 + $0xe0] sm:$0xff] %v2272_v11  ;;  %v2234_v24 = vmul.f32 %v2175_v3, %v4065_v4  ;;  %v2177_v21 = vpop.f32.mrb[93].mxu1 }
 0x73d   : > { %2313 = vst [vmem:[%s3841_s17 + $0xe8] sm:$0xff] %v2273_v2  ;;  %v2235_v25 = vmul.f32 %v2177_v21, %v4066_v6 }
 0x73e   : > { %v2274_v56 = vmul.f32 %v2234_v24, %v4067_v54 }
 0x73f   : > { %v2275_v27 = vmul.f32 %v2235_v25, %v4068_v30  ;;  %v2181_v28 = vpop.f32.mrb[94].mxu1 }
 0x740   : > { %2314 = vst [vmem:[%s3841_s17 + $0xf0] sm:$0xff] %v2274_v56  ;;  %v2236_v12 = vmul.f32 %v2181_v28, %v4069_v31  ;;  %v2183_v14 = vpop.f32.mrb[95].mxu1 }
 0x741   : > { %2315 = vst [vmem:[%s3841_s17 + $0xf8] sm:$0xff] %v2275_v27  ;;  %v2237_v29 = vmul.f32 %v2183_v14, %v4070_v33 }
 0x742   : > { %v2276_v34 = vmul.f32 %v2236_v12, %v4071_v35 }
 0x743   : > { %v2277_v5 = vmul.f32 %v2237_v29, %v4072_v1  ;;  %v2187_v36 = vpop.f32.mrb[96].mxu1 }
 0x744   : > { %2316 = vst [vmem:[%s3841_s17 + $0x100] sm:$0xff] %v2276_v34  ;;  %v2238_v20 = vmul.f32 %v2187_v36, %v4073_v18  ;;  %v2189_v37 = vpop.f32.mrb[97].mxu1 }
 0x745   : > { %2317 = vst [vmem:[%s3841_s17 + $0x108] sm:$0xff] %v2277_v5  ;;  %v2239_v22 = vmul.f32 %v2189_v37, %v4074_v63 }
 0x746   : > { %v2278_v26 = vmul.f32 %v2238_v20, %v4075_v39 }
 0x747   : > { %v2279_v40 = vmul.f32 %v2239_v22, %v4076_v44  ;;  %v2193_v7 = vpop.f32.mrb[98].mxu1 }
 0x748   : > { %2318 = vst [vmem:[%s3841_s17 + $0x110] sm:$0xff] %v2278_v26  ;;  %v2240_v42 = vmul.f32 %v2193_v7, %v4077_v60  ;;  %v2195_v45 = vpop.f32.mrb[99].mxu1 }
 0x749   : > { %2319 = vst [vmem:[%s3841_s17 + $0x118] sm:$0xff] %v2279_v40  ;;  %v2241_v43 = vmul.f32 %v2195_v45, %v4078_v46 }
 0x74a   : > { %v2280_v61 = vmul.f32 %v2240_v42, %v3828_v58  ;;  %v4082_v58 = vld [vmem:[#allocation30_spill] sm:$0xff] }
 0x74b   : > { %v2281_v9 = vmul.f32 %v2241_v43, %v3830_v38  ;;  %v2199_v51 = vpop.f32.mrb[100].mxu1 }
 0x74c   : > { %2320 = vst [vmem:[%s3841_s17 + $0x120] sm:$0xff] %v2280_v61  ;;  %v2242_v48 = vmul.f32 %v2199_v51, %v4079_v47  ;;  %v2201_v52 = vpop.f32.mrb[101].mxu1 }
 0x74d   : > { %2321 = vst [vmem:[%s3841_s17 + $0x128] sm:$0xff] %v2281_v9  ;;  %v2243_v8 = vmul.f32 %v2201_v52, %v4080_v23 }
 0x74e   : > { %v2282_v49 = vmul.f32 %v2242_v48, %v4081_v53 }
 0x74f   : > { %v2283_v38 = vmul.f32 %v2243_v8, %v4082_v58 }
 0x750   : > { %2322 = vst [vmem:[%s3841_s17 + $0x130] sm:$0xff] %v2282_v49 }
 0x751   : > { %2323 = vst [vmem:[%s3841_s17 + $0x138] sm:$0xff] %v2283_v38 }
 0x752   : > { %2866 = shalt.err (!%p2863_p3)
}
 0x753   : > { %s2867_s10 = scalar_lea.hbm %s3961_s25, 5120  ;;  %s2871_s21 = scalar_lea.hbm %s4023_s12, 10240 }
 0x754   : > { %p2868_p4 = scmp.ne.s32.totalorder %s3961_s25, %s2867_s10  ;;  %p2872_p9 = scmp.lt.u32.totalorder %s3961_s25, %s4023_s12 }
 0x755   : > { %p2873_p10 = scmp.lt.u32.totalorder %s2871_s21, %s2867_s10  ;;  %p2875_p12 = scmp.lt.u32.totalorder %s2867_s10, %s3961_s25 }
 0x756   : > { %p2869_p7 = pnand %p2868_p4, %p3033_p5 }
 0x757   : > { %p2874_p11 = por %p2873_p10, %p2872_p9 }
 0x758   : > { %p2870_p8 = pneg %p2869_p7 }
 0x759   : > { %p2876_p13 = por %p2875_p12, %p2874_p11 }
 0x75b   : > { %p2877_p0 = pnand %p2876_p13, %p2870_p8 }
 0x75d   : > { %2880 = shalt.err (!%p2877_p0)
}
 0x75e   : > { %s2920_s26 = smov 256   ;;  %s2921_s14 = smov 16  }
 0x75f   : > { %2794 = dma.vmem_to_hbm [thread:$0]  (%p3033_p5), %s3963_s22, 5120, %s3961_s25, %s3970_s0, %s2920_s26, %s2920_s26, %s2921_s14  }
 0x760 PF: > { %p2800_p1 = scmp.ge.s32.totalorder %s2915_s30, 2  ;;  %s2361_s1 = sand.u32 1, %s2903_s27  }
 0x761   : > { %s2362_s6 = scalar_lea.sflag [#allocation4], %s2361_s1 }
 0x762   : > { %p2797_p2 = pnand %p2800_p1, %p3037_p6 }
 0x764   : > { %2898 = dma.done.wait (!%p2797_p2), %s2362_s6, 5120  }
 0x765   : > { %2900 = vsyncadd (!%p2797_p2), %s2362_s6, 4294962176  ;;  %p25_p3 = scmp.ge.s32.totalorder %s3020_s15, 4   ;;  %s4083_s27 = smov %s2907_s28 }
 0x766   : > { %s4084_s28 = smov %s2911_s29  ;;  %s4085_s29 = smov %s3031_s18 }
 0x767   : > { %s4086_s30 = smov %s3020_s15  ;;  %27 = sbr.rel (!%p25_p3) target bundleno = 8 (0x8), region = 118 }
 0x76e   :  { %2375 = vsyncpa [#allocation4], 1 }
 0x76f   :  { %2377 = vsyncpa [#allocation4 + $0x1], 1 }

</bundles_post_ra>
